<compile_context>
chip_gen: v6e
topology: v6e:2x2x1
jax: 0.10.0
libtpu: 0.0.40
codegen_flags: <defaults>
</compile_context>

<pallas_src>
import numpy as np
import jax
import jax.numpy as jnp
from jax.experimental import pallas as pl
from jax.experimental.pallas import tpu as pltpu

PATCH = 8
NFREQ = PATCH * (PATCH // 2 + 1)   # 40 rfft2 bins of an 8x8 patch
NSPEC = 2 * NFREQ                  # 80 = [re | im] fused spectrum width

# MXU input dtype for all matmuls (accumulation is always f32).
# Set to jnp.bfloat16 on v6e/v7x for ~2x MXU throughput and half the matmul DMA bytes;
# kept f32 here for exact numerical parity with the PyTorch reference.
MXU_DTYPE = jnp.float32

# ---- constant real DFT operators, RE/IM fused (parameter-setup constants, exact) ------
_eye = np.eye(PATCH * PATCH, dtype=np.float64).reshape(-1, PATCH, PATCH)
_spec = np.fft.rfft2(_eye)                                              # (64, 8, 5) complex
_rre = _spec.real.reshape(PATCH * PATCH, NFREQ)
_rim = _spec.imag.reshape(PATCH * PATCH, NFREQ)
_eyec = np.eye(NFREQ, dtype=np.complex128).reshape(-1, PATCH, PATCH // 2 + 1)
_ire = np.fft.irfft2(_eyec, s=(PATCH, PATCH)).reshape(NFREQ, PATCH * PATCH)
_iim = np.fft.irfft2(1j * _eyec, s=(PATCH, PATCH)).reshape(NFREQ, PATCH * PATCH)
RFFT2_F = jnp.asarray(np.concatenate([_rre, _rim], axis=1), jnp.float32)    # (64, 80)
IRFFT2_G = jnp.asarray(np.concatenate([_ire, _iim], axis=0), jnp.float32)   # (80, 64)


def _row_tile(n, cap=256):
    """Row tile: bounded (pipelined) for big n, full extent for small n."""
    return n if n <= cap else cap


def _erf(x):
    # Abramowitz & Stegun 7.1.26, |err| < 1.5e-7 (~f32 eps), for exact-erf GELU.
    a1, a2, a3, a4, a5 = 0.254829592, -0.284496736, 1.421413741, -1.453152027, 1.061405429
    pc = 0.3275911
    s = jnp.where(x >= 0.0, 1.0, -1.0)
    ax = jnp.abs(x)
    t = 1.0 / (1.0 + pc * ax)
    poly = ((((a5 * t + a4) * t + a3) * t + a2) * t + a1) * t
    return s * (1.0 - poly * jnp.exp(-ax * ax))


def _gelu(x):
    return 0.5 * x * (1.0 + _erf(x * 0.7071067811865476))


def _layernorm(xv, g, b):
    mu = jnp.mean(xv, axis=-1, keepdims=True)
    var = jnp.mean((xv - mu) ** 2, axis=-1, keepdims=True)   # biased variance
    return (xv - mu) / jnp.sqrt(var + 1e-5) * g + b


def _dw3x3_band(band_ref, wv, TH, W, C):
    """Depthwise 3x3 over a halo'd row band (TH+2, W+2, C) -> (TH, W, C).

    Taps grouped by column: only 3 sublane-crossing slices (vs 9 shifted slices)."""
    a0 = jnp.zeros((TH, W + 2, C), jnp.float32)
    a1 = jnp.zeros((TH, W + 2, C), jnp.float32)
    a2 = jnp.zeros((TH, W + 2, C), jnp.float32)
    for dy in range(3):
        rows = band_ref[dy:dy + TH]                       # cheap major-dim slice
        a0 = a0 + rows * wv[dy, 0].reshape(1, 1, C)
        a1 = a1 + rows * wv[dy, 1].reshape(1, 1, C)
        a2 = a2 + rows * wv[dy, 2].reshape(1, 1, C)
    return a0[:, 0:W, :] + a1[:, 1:W + 1, :] + a2[:, 2:W + 2, :]


# ------------------------------- Pallas kernels -----------------------------------------
def pl_ln_matmul(x, gamma, beta, w):
    """Fused WithBias LayerNorm (over lanes) + 1x1 conv (matmul). x:(N,C), w:(C,M)."""
    n, c = x.shape
    m = w.shape[1]
    rt = _row_tile(n)

    def kern(x_ref, g_ref, b_ref, w_ref, o_ref):
        y = _layernorm(x_ref[...], g_ref[...], b_ref[...])
        o_ref[...] = jnp.dot(y.astype(MXU_DTYPE), w_ref[...].astype(MXU_DTYPE),
                             preferred_element_type=jnp.float32)

    return pl.pallas_call(
        kern,
        out_shape=jax.ShapeDtypeStruct((n, m), jnp.float32),
        grid=(pl.cdiv(n, rt),),
        in_specs=[pl.BlockSpec((rt, c), lambda i: (i, 0)),
                  pl.BlockSpec((1, c), lambda i: (0, 0)),
                  pl.BlockSpec((1, c), lambda i: (0, 0)),
                  pl.BlockSpec((c, m), lambda i: (0, 0))],
        out_specs=pl.BlockSpec((rt, m), lambda i: (i, 0)),
        compiler_params=pltpu.CompilerParams(dimension_semantics=("parallel",)),
    )(x, gamma, beta, w)


def pl_fft_filter(xp, w80):
    """DFFN spectral filter: irfft2(rfft2(patch) * filter_c).

    xp:(C, R, 64) channel-major patches, w80:(C, 1, 80) per-channel [w|w] filter.
    Fused DFT operators -> 2 MXU dots; filter indexed per channel (never broadcast)."""
    C, R, _ = xp.shape
    rt = _row_tile(R)

    def kern(x_ref, w_ref, f_ref, g_ref, o_ref):
        spec = jnp.dot(x_ref[...].astype(MXU_DTYPE), f_ref[...].astype(MXU_DTYPE),
                       preferred_element_type=jnp.float32)          # (rt, 80) = [re|im]
        spec = spec * w_ref[...]                                     # (1, 80) broadcast
        o_ref[...] = jnp.dot(spec.astype(MXU_DTYPE), g_ref[...].astype(MXU_DTYPE),
                             preferred_element_type=jnp.float32)     # (rt, 64)

    return pl.pallas_call(
        kern,
        out_shape=jax.ShapeDtypeStruct((C, R, PATCH * PATCH), jnp.float32),
        grid=(C, pl.cdiv(R, rt)),
        in_specs=[pl.BlockSpec((None, rt, PATCH * PATCH), lambda c, i: (c, i, 0)),
                  pl.BlockSpec((None, 1, NSPEC), lambda c, i: (c, 0, 0)),
                  pl.BlockSpec((PATCH * PATCH, NSPEC), lambda c, i: (0, 0)),
                  pl.BlockSpec((NSPEC, PATCH * PATCH), lambda c, i: (0, 0))],
        out_specs=pl.BlockSpec((None, rt, PATCH * PATCH), lambda c, i: (c, i, 0)),
        compiler_params=pltpu.CompilerParams(dimension_semantics=("parallel", "parallel")),
    )(xp, w80, RFFT2_F, IRFFT2_G)


def pl_fft_corr(qp, kp):
    """FSAS: irfft2(rfft2(q_patch) * rfft2(k_patch)). qp,kp:(P,64). 3 MXU dots (was 6)."""
    p = qp.shape[0]
    rt = _row_tile(p)

    def kern(q_ref, k_ref, f_ref, g_ref, o_ref):
        fm = f_ref[...].astype(MXU_DTYPE)
        qs = jnp.dot(q_ref[...].astype(MXU_DTYPE), fm, preferred_element_type=jnp.float32)
        ks = jnp.dot(k_ref[...].astype(MXU_DTYPE), fm, preferred_element_type=jnp.float32)
        qre, qim = qs[:, :NFREQ], qs[:, NFREQ:]
        kre, kim = ks[:, :NFREQ], ks[:, NFREQ:]
        ospec = jnp.concatenate([qre * kre - qim * kim, qre * kim + qim * kre], axis=-1)
        o_ref[...] = jnp.dot(ospec.astype(MXU_DTYPE), g_ref[...].astype(MXU_DTYPE),
                             preferred_element_type=jnp.float32)

    return pl.pallas_call(
        kern,
        out_shape=jax.ShapeDtypeStruct((p, PATCH * PATCH), jnp.float32),
        grid=(pl.cdiv(p, rt),),
        in_specs=[pl.BlockSpec((rt, PATCH * PATCH), lambda i: (i, 0)),
                  pl.BlockSpec((rt, PATCH * PATCH), lambda i: (i, 0)),
                  pl.BlockSpec((PATCH * PATCH, NSPEC), lambda i: (0, 0)),
                  pl.BlockSpec((NSPEC, PATCH * PATCH), lambda i: (0, 0))],
        out_specs=pl.BlockSpec((rt, PATCH * PATCH), lambda i: (i, 0)),
        compiler_params=pltpu.CompilerParams(dimension_semantics=("parallel",)),
    )(qp, kp, RFFT2_F, IRFFT2_G)


def pl_dwconv3x3(x, w, th=8):
    """Depthwise 3x3 conv, stride 1, zero pad 1. Row-banded with manual halo DMA.

    x:(B,H,W,C) NHWC, w:(3,3,C). VMEM holds only a (TH+2, W+2, C) band per step."""
    B, H, W, C = x.shape
    TH = th if H % th == 0 else H
    xp = jnp.pad(x, ((0, 0), (1, 1), (1, 1), (0, 0)))      # zero border (see TODO above)

    def kern(xp_ref, w_ref, o_ref, band, sem):
        b = pl.program_id(0)
        i = pl.program_id(1)
        cp = pltpu.make_async_copy(xp_ref.at[b, pl.ds(i * TH, TH + 2)], band, sem)
        cp.start()
        cp.wait()
        o_ref[...] = _dw3x3_band(band, w_ref[...], TH, W, C)

    return pl.pallas_call(
        kern,
        out_shape=jax.ShapeDtypeStruct((B, H, W, C), jnp.float32),
        grid=(B, H // TH),
        in_specs=[pl.BlockSpec(memory_space=pl.ANY),
                  pl.BlockSpec((3, 3, C), lambda b, i: (0, 0, 0))],
        out_specs=pl.BlockSpec((None, TH, W, C), lambda b, i: (b, i, 0, 0)),
        scratch_shapes=[pltpu.VMEM((TH + 2, W + 2, C), jnp.float32),
                        pltpu.SemaphoreType.DMA],
        compiler_params=pltpu.CompilerParams(dimension_semantics=("parallel", "parallel")),
    )(xp, w)


def pl_dwconv_gate_proj(x, dw_w, po_w, res, th=8):
    """Fused DFFN tail: dwconv3x3 -> chunk -> GELU(x1)*x2 -> project_out -> + residual.

    x:(B,H,W,2h), dw_w:(3,3,2h), po_w:(h,dim), res:(B,H,W,dim) -> (B,H,W,dim)."""
    B, H, W, C = x.shape
    hidden = C // 2
    dim = po_w.shape[1]
    TH = th if H % th == 0 else H
    xp = jnp.pad(x, ((0, 0), (1, 1), (1, 1), (0, 0)))

    def kern(xp_ref, w_ref, p_ref, r_ref, o_ref, band, sem):
        b = pl.program_id(0)
        i = pl.program_id(1)
        cp = pltpu.make_async_copy(xp_ref.at[b, pl.ds(i * TH, TH + 2)], band, sem)
        cp.start()
        cp.wait()
        y = _dw3x3_band(band, w_ref[...], TH, W, C)          # (TH, W, 2h)
        x1 = y[..., :hidden]
        x2 = y[..., hidden:]
        g = (_gelu(x1) * x2).reshape(TH * W, hidden)
        out = jnp.dot(g.astype(MXU_DTYPE), p_ref[...].astype(MXU_DTYPE),
                      preferred_element_type=jnp.float32)
        o_ref[...] = out.reshape(TH, W, dim) + r_ref[...]

    return pl.pallas_call(
        kern,
        out_shape=jax.ShapeDtypeStruct((B, H, W, dim), jnp.float32),
        grid=(B, H // TH),
        in_specs=[pl.BlockSpec(memory_space=pl.ANY),
                  pl.BlockSpec((3, 3, C), lambda b, i: (0, 0, 0)),
                  pl.BlockSpec((hidden, dim), lambda b, i: (0, 0)),
                  pl.BlockSpec((None, TH, W, dim), lambda b, i: (b, i, 0, 0))],
        out_specs=pl.BlockSpec((None, TH, W, dim), lambda b, i: (b, i, 0, 0)),
        scratch_shapes=[pltpu.VMEM((TH + 2, W + 2, C), jnp.float32),
                        pltpu.SemaphoreType.DMA],
        compiler_params=pltpu.CompilerParams(dimension_semantics=("parallel", "parallel")),
    )(xp, dw_w, po_w, res)


def pl_ln_gate_proj_res(o, v, gamma, beta, w, res):
    """Fused FSAS tail: out = (v * LayerNorm(o)) @ w + res. o,v:(N,2C), w:(2C,C), res:(N,C)."""
    n, c2 = o.shape
    dim = w.shape[1]
    rt = _row_tile(n)

    def kern(o_ref, v_ref, g_ref, b_ref, w_ref, r_ref, out_ref):
        onorm = _layernorm(o_ref[...], g_ref[...], b_ref[...])
        gated = v_ref[...] * onorm
        out_ref[...] = jnp.dot(gated.astype(MXU_DTYPE), w_ref[...].astype(MXU_DTYPE),
                               preferred_element_type=jnp.float32) + r_ref[...]

    return pl.pallas_call(
        kern,
        out_shape=jax.ShapeDtypeStruct((n, dim), jnp.float32),
        grid=(pl.cdiv(n, rt),),
        in_specs=[pl.BlockSpec((rt, c2), lambda i: (i, 0)),
                  pl.BlockSpec((rt, c2), lambda i: (i, 0)),
                  pl.BlockSpec((1, c2), lambda i: (0, 0)),
                  pl.BlockSpec((1, c2), lambda i: (0, 0)),
                  pl.BlockSpec((c2, dim), lambda i: (0, 0)),
                  pl.BlockSpec((rt, dim), lambda i: (i, 0))],
        out_specs=pl.BlockSpec((rt, dim), lambda i: (i, 0)),
        compiler_params=pltpu.CompilerParams(dimension_semantics=("parallel",)),
    )(o, v, gamma, beta, w, res)


# ----------------------------------- glue (JAX) -----------------------------------------
def _to_patches_cm(x):
    # 'b (h p1) (w p2) c -> c (b h w) (p1 p2)'  (channel-major rows)
    B, H, W, C = x.shape
    nH, nW = H // PATCH, W // PATCH
    x = x.reshape(B, nH, PATCH, nW, PATCH, C)
    x = jnp.transpose(x, (5, 0, 1, 3, 2, 4))
    return x.reshape(C, B * nH * nW, PATCH * PATCH)


def _from_patches_cm(xf, B, H, W, C):
    nH, nW = H // PATCH, W // PATCH
    x = xf.reshape(C, B, nH, nW, PATCH, PATCH)
    x = jnp.transpose(x, (1, 2, 4, 3, 5, 0))
    return x.reshape(B, H, W, C)


def dffn_block(x, p):
    """x + DFFN(LayerNorm_withbias(x)). x:(B,H,W,dim) NHWC."""
    B, H, W, C = x.shape
    h2 = p['dffn_pi_w'].shape[1]
    y = pl_ln_matmul(x.reshape(B * H * W, C), p['norm2_w'], p['norm2_b'], p['dffn_pi_w'])
    y = y.reshape(B, H, W, h2)
    w80 = jnp.concatenate([p['dffn_fft'].reshape(h2, NFREQ)] * 2, axis=-1).reshape(h2, 1, NSPEC)
    yf = pl_fft_filter(_to_patches_cm(y), w80)
    y = _from_patches_cm(yf, B, H, W, h2)
    return pl_dwconv_gate_proj(y, p['dffn_dw_w'], p['dffn_po_w'], x)   # residual fused


def fsas_block(x, p):
    """x + FSAS(LayerNorm_withbias(x)). x:(B,H,W,dim) NHWC."""
    B, H, W, C = x.shape
    hid = pl_ln_matmul(x.reshape(B * H * W, C), p['norm1_w'], p['norm1_b'], p['fsas_th_w'])
    hid = hid.reshape(B, H, W, 6 * C)
    hid = pl_dwconv3x3(hid, p['fsas_thdw_w'])
    q, k, v = hid[..., :2 * C], hid[..., 2 * C:4 * C], hid[..., 4 * C:]
    qp = _to_patches_cm(q).reshape(-1, PATCH * PATCH)
    kp = _to_patches_cm(k).reshape(-1, PATCH * PATCH)
    of = pl_fft_corr(qp, kp)
    o = _from_patches_cm(of.reshape(2 * C, -1, PATCH * PATCH), B, H, W, 2 * C)
    out = pl_ln_gate_proj_res(o.reshape(B * H * W, 2 * C), v.reshape(B * H * W, 2 * C),
                              p['fsas_norm_w'], p['fsas_norm_b'], p['fsas_po_w'],
                              x.reshape(B * H * W, C))
    return out.reshape(B, H, W, C)


def transformer_block(x_nchw, params, att=False):
    x = jnp.transpose(x_nchw, (0, 2, 3, 1)).astype(jnp.float32)   # NCHW -> NHWC
    if att:
        x = fsas_block(x, params)      # residual fused in kernel
    x = dffn_block(x, params)          # residual fused in kernel
    return jnp.transpose(x, (0, 3, 1, 2))                         # back to NCHW


def init_params(key, dim, ffn_expansion_factor=2.66, att=False):
    hidden = int(dim * ffn_expansion_factor)
    h2 = hidden * 2
    ks = jax.random.split(key, 6)

    def w(k, shape, fan_in):
        return (jax.random.uniform(k, shape, jnp.float32, -1.0, 1.0) / np.sqrt(fan_in)).astype(jnp.float32)

    p = {
        'norm2_w': jnp.ones((1, dim), jnp.float32),
        'norm2_b': jnp.zeros((1, dim), jnp.float32),
        'dffn_pi_w': w(ks[0], (dim, h2), dim),             # Conv2d(dim, 2h, 1), transposed
        'dffn_dw_w': w(ks[1], (3, 3, h2), 9),              # depthwise 3x3
        'dffn_fft': jnp.ones((h2, PATCH, PATCH // 2 + 1), jnp.float32),   # nn.Parameter(ones)
        'dffn_po_w': w(ks[2], (hidden, dim), hidden),      # Conv2d(h, dim, 1)
    }
    if att:
        p.update({
            'norm1_w': jnp.ones((1, dim), jnp.float32),
            'norm1_b': jnp.zeros((1, dim), jnp.float32),
            'fsas_th_w': w(ks[3], (dim, dim * 6), dim),    # Conv2d(dim, 6*dim, 1)
            'fsas_thdw_w': w(ks[4], (3, 3, dim * 6), 9),   # depthwise 3x3
            'fsas_norm_w': jnp.ones((1, 2 * dim), jnp.float32),
            'fsas_norm_b': jnp.zeros((1, 2 * dim), jnp.float32),
            'fsas_po_w': w(ks[5], (2 * dim, dim), 2 * dim),   # Conv2d(2*dim, dim, 1)
        })
    return p


if __name__ == "__main__":
    B, dim, H, W = 2, 4, 16, 16
    att = True   # exercise both the FSAS attention path and the DFFN path
    x = jax.random.normal(jax.random.PRNGKey(0), (B, dim, H, W), jnp.float32)
    params = init_params(jax.random.PRNGKey(1), dim, att=att)

    y = transformer_block(x, params, att=att)
    y = jax.block_until_ready(y)
    assert y.shape == (B, dim, H, W)
    assert bool(jnp.all(jnp.isfinite(y)))
    print("KERNEL_OK")
</pallas_src>

<mosaic_0001>
module attributes {stable_mosaic.version = 11 : i64} {
  func.func @kern(%arg0: i32, %arg1: memref<256x4xf32, #tpu.memory_space<vmem>>, %arg2: memref<1x4xf32, #tpu.memory_space<vmem>>, %arg3: memref<1x4xf32, #tpu.memory_space<vmem>>, %arg4: memref<4x24xf32, #tpu.memory_space<vmem>>, %arg5: memref<256x24xf32, #tpu.memory_space<vmem>>) attributes {dimension_semantics = [#tpu.dimension_semantics<parallel>], iteration_bounds = array<i64: 2>, scalar_prefetch = 0 : i64, scratch_operands = 0 : i64, tpu.core_type = #tpu.core_type<tc>, window_params = [{transform_indices = @transform_0, window_bounds = array<i64: 256, 4>}, {pipeline_mode = #tpu.pipeline_mode<synchronous>, transform_indices = @transform_1, window_bounds = array<i64: 1, 4>}, {pipeline_mode = #tpu.pipeline_mode<synchronous>, transform_indices = @transform_2, window_bounds = array<i64: 1, 4>}, {pipeline_mode = #tpu.pipeline_mode<synchronous>, transform_indices = @transform_3, window_bounds = array<i64: 4, 24>}, {transform_indices = @transform_4, window_bounds = array<i64: 256, 24>}]} {
    %c0 = arith.constant 0 : index
    %c0_0 = arith.constant 0 : index
    %0 = vector.load %arg1[%c0, %c0_0] : memref<256x4xf32, #tpu.memory_space<vmem>>, vector<256x4xf32>
    %c0_1 = arith.constant 0 : index
    %c0_2 = arith.constant 0 : index
    %1 = vector.load %arg2[%c0_1, %c0_2] : memref<1x4xf32, #tpu.memory_space<vmem>>, vector<1x4xf32>
    %c0_3 = arith.constant 0 : index
    %c0_4 = arith.constant 0 : index
    %2 = vector.load %arg3[%c0_3, %c0_4] : memref<1x4xf32, #tpu.memory_space<vmem>>, vector<1x4xf32>
    %cst = arith.constant dense<0.000000e+00> : vector<256xf32>
    %3 = vector.multi_reduction <add>, %0, %cst [1] : vector<256x4xf32> to vector<256xf32>
    %4 = vector.shape_cast %3 : vector<256xf32> to vector<256x1xf32>
    %cst_5 = arith.constant 4.000000e+00 : f32
    %5 = vector.broadcast %cst_5 : f32 to vector<256x1xf32>
    %6 = arith.divf %4, %5 : vector<256x1xf32>
    %7 = vector.broadcast %6 : vector<256x1xf32> to vector<256x4xf32>
    %8 = arith.subf %0, %7 : vector<256x4xf32>
    %9 = arith.mulf %8, %8 : vector<256x4xf32>
    %cst_6 = arith.constant dense<0.000000e+00> : vector<256xf32>
    %10 = vector.multi_reduction <add>, %9, %cst_6 [1] : vector<256x4xf32> to vector<256xf32>
    %11 = vector.shape_cast %10 : vector<256xf32> to vector<256x1xf32>
    %cst_7 = arith.constant 4.000000e+00 : f32
    %12 = vector.broadcast %cst_7 : f32 to vector<256x1xf32>
    %13 = arith.divf %11, %12 : vector<256x1xf32>
    %14 = vector.broadcast %6 : vector<256x1xf32> to vector<256x4xf32>
    %15 = arith.subf %0, %14 : vector<256x4xf32>
    %cst_8 = arith.constant 9.99999974E-6 : f32
    %16 = vector.broadcast %cst_8 : f32 to vector<256x1xf32>
    %17 = arith.addf %13, %16 : vector<256x1xf32>
    %18 = math.sqrt %17 : vector<256x1xf32>
    %19 = vector.broadcast %18 : vector<256x1xf32> to vector<256x4xf32>
    %20 = arith.divf %15, %19 : vector<256x4xf32>
    %21 = vector.broadcast %1 : vector<1x4xf32> to vector<256x4xf32>
    %22 = arith.mulf %20, %21 : vector<256x4xf32>
    %23 = vector.broadcast %2 : vector<1x4xf32> to vector<256x4xf32>
    %24 = arith.addf %22, %23 : vector<256x4xf32>
    %c0_9 = arith.constant 0 : index
    %c0_10 = arith.constant 0 : index
    %25 = vector.load %arg4[%c0_9, %c0_10] : memref<4x24xf32, #tpu.memory_space<vmem>>, vector<4x24xf32>
    %cst_11 = arith.constant dense<0.000000e+00> : vector<256x24xf32>
    %26 = tpu.matmul %24, %25, %cst_11 {dimension_numbers = #tpu.dot_dimension_numbers<[1], [0], [0], [1], [0, 0, 1, 1], [], []>} : vector<256x4xf32>, vector<4x24xf32>, vector<256x24xf32> -> vector<256x24xf32>
    %c0_12 = arith.constant 0 : index
    %c0_13 = arith.constant 0 : index
    %27 = vector.load %arg5[%c0_12, %c0_13] : memref<256x24xf32, #tpu.memory_space<vmem>>, vector<256x24xf32>
    tpu.vector_store %arg5[%c0_12, %c0_13], %26 {strides = array<i32>} : memref<256x24xf32, #tpu.memory_space<vmem>>, vector<256x24xf32>,
    return
  }
  func.func @transform_0(%arg0: i32) -> (i32, i32) {
    %c0_i32 = arith.constant 0 : i32
    %c0_i32_0 = arith.constant 0 : i32
    return %arg0, %c0_i32 : i32, i32
  }
  func.func @transform_1(%arg0: i32) -> (i32, i32) {
    %c0_i32 = arith.constant 0 : i32
    %c0_i32_0 = arith.constant 0 : i32
    %c0_i32_1 = arith.constant 0 : i32
    return %c0_i32, %c0_i32_0 : i32, i32
  }
  func.func @transform_2(%arg0: i32) -> (i32, i32) {
    %c0_i32 = arith.constant 0 : i32
    %c0_i32_0 = arith.constant 0 : i32
    %c0_i32_1 = arith.constant 0 : i32
    return %c0_i32, %c0_i32_0 : i32, i32
  }
  func.func @transform_3(%arg0: i32) -> (i32, i32) {
    %c0_i32 = arith.constant 0 : i32
    %c0_i32_0 = arith.constant 0 : i32
    %c0_i32_1 = arith.constant 0 : i32
    return %c0_i32, %c0_i32_0 : i32, i32
  }
  func.func @transform_4(%arg0: i32) -> (i32, i32) {
    %c0_i32 = arith.constant 0 : i32
    %c0_i32_0 = arith.constant 0 : i32
    return %arg0, %c0_i32 : i32, i32
  }
}

</mosaic_0001>

<bundles_post_ra>
// kernel: tpu_custom_call.1
= control target key start
LH: loop header
LB: loop body
LE: loop exit
PB: predicated region body
PF: predicated region fallthrough
CT: control target
= control target key end

     0   :  { %s1668_s15 = smov 0   ;;  %s2688_s0 = inlined_call_operand.vmem [shape: f32[512,4], index: 0, kind: input, shape index: {}]   ;;  %s2689_s1 = inlined_call_operand.vmem [shape: f32[1,4], index: 1, kind: input, shape index: {}]   ;;  %s2690_s2 = inlined_call_operand.vmem [shape: f32[1,4], index: 2, kind: input, shape index: {}]   ;;  %s2691_s3 = inlined_call_operand.vmem [shape: f32[4,24], index: 3, kind: input, shape index: {}]   ;;  %s2692_s4 = inlined_call_operand.vmem [shape: f32[512,24], index: 4, kind: output, shape index: {}]  }
   0x1 LB: > { %s1368_s16 = sadd.s32 4294967295, %s1641_s15   ;;  %p1372_p0 = scmp.ge.s32.totalorder %s1641_s15, 1  ;;  %s1641_s15 = sphi %s1668_s15, %s14_s15  }
   0x2   : > { %p163_p1 = scmp.lt.s32.totalorder %s1641_s15, 3 }
   0x4   : > { %p164_p2 = pnand %p1372_p0, %p163_p1 }
   0x6   : > { %167 = sbr.rel (%p164_p2) target bundleno = 628 (0x274), region = 36 }
   0xb   : > { %s1373_s17 = sshll.u32 %s1368_s16, 5  ;;  %vm235_vm0 = vcmask 31744   ;;  %vm1050_vm1 = vcmask 1043456  }
   0xc   : > { %p190_p3 = scmp.lt.s32.totalorder %s1373_s17, 63 }
   0xe   : > { %s2709_s17 = smov (!%p190_p3, %s1373_s17), 63 }
   0xf   : > { %s1374_s18 = sshll.u32 %s2709_s17, 3 }
  0x10   : > { %s1684_s21 = scalar_lea.vmem %s2688_s0, %s1374_s18  ;;  %s2619_s30 = scalar_lea.vmem %s2692_s4, %s1374_s18 }
  0x11   : > { %v1687_v0 = vld [vmem:[%s1684_s21] sm:$0xff]  ;;  %v1690_v1 = vld [vmem:[%s1684_s21 + $0x8] sm:$0xff]  ;;  %v1707_v8 = vld [vmem:[%s1684_s21 + $0x10] sm:$0xff] }
  0x12   : > { %v1693_v2 = vld [vmem:[%s1684_s21 + $0x80] sm:$0xff]  ;;  %v236_v3 = vsel %vm235_vm0, %v1687_v0, 0.0  ;;  %v239_v4 = vsel %vm235_vm0, %v1690_v1, 0.0  ;;  %v1700_v5 = vld [vmem:[%s1684_s21 + $0x88] sm:$0xff]  ;;  %v1710_v9 = vld [vmem:[%s1684_s21 + $0x90] sm:$0xff]  ;;  %v242_v10 = vsel %vm235_vm0, %v1707_v8, 0.0 }
  0x13   : > { %237 = vadd.xlane.f32.xlu0 %v236_v3  ;;  %240 = vadd.xlane.f32.xlu1 %v239_v4  ;;  %v284_v6 = vsel %vm235_vm0, %v1693_v2, 0.0  ;;  %v287_v7 = vsel %vm235_vm0, %v1700_v5, 0.0  ;;  %v290_v11 = vsel %vm235_vm0, %v1710_v9, 0.0  ;;  %v1717_v12 = vld [vmem:[%s1684_s21 + $0x18] sm:$0xff]  ;;  %v1727_v16 = vld [vmem:[%s1684_s21 + $0x20] sm:$0xff]  ;;  %v1737_v20 = vld [vmem:[%s1684_s21 + $0x28] sm:$0xff] }
  0x14   : > { %v1720_v13 = vld [vmem:[%s1684_s21 + $0x98] sm:$0xff]  ;;  %v245_v14 = vsel %vm235_vm0, %v1717_v12, 0.0  ;;  %v1730_v17 = vld [vmem:[%s1684_s21 + $0xa0] sm:$0xff]  ;;  %v248_v18 = vsel %vm235_vm0, %v1727_v16, 0.0  ;;  %v1740_v21 = vld [vmem:[%s1684_s21 + $0xa8] sm:$0xff]  ;;  %v251_v22 = vsel %vm235_vm0, %v1737_v20, 0.0 }
  0x15   : > { %v293_v15 = vsel %vm235_vm0, %v1720_v13, 0.0  ;;  %v296_v19 = vsel %vm235_vm0, %v1730_v17, 0.0  ;;  %v299_v23 = vsel %vm235_vm0, %v1740_v21, 0.0  ;;  %v1747_v24 = vld [vmem:[%s1684_s21 + $0x30] sm:$0xff]  ;;  %v1757_v28 = vld [vmem:[%s1684_s21 + $0x38] sm:$0xff]  ;;  %v1767_v32 = vld [vmem:[%s1684_s21 + $0x40] sm:$0xff] }
  0x16   : > { %v1750_v25 = vld [vmem:[%s1684_s21 + $0xb0] sm:$0xff]  ;;  %v254_v26 = vsel %vm235_vm0, %v1747_v24, 0.0  ;;  %v1760_v29 = vld [vmem:[%s1684_s21 + $0xb8] sm:$0xff]  ;;  %v257_v30 = vsel %vm235_vm0, %v1757_v28, 0.0  ;;  %v1770_v33 = vld [vmem:[%s1684_s21 + $0xc0] sm:$0xff]  ;;  %v260_v34 = vsel %vm235_vm0, %v1767_v32, 0.0 }
  0x17   : > { %285 = vadd.xlane.f32.xlu0 %v284_v6  ;;  %288 = vadd.xlane.f32.xlu1 %v287_v7  ;;  %v302_v27 = vsel %vm235_vm0, %v1750_v25, 0.0  ;;  %v305_v31 = vsel %vm235_vm0, %v1760_v29, 0.0  ;;  %v308_v35 = vsel %vm235_vm0, %v1770_v33, 0.0  ;;  %v1777_v36 = vld [vmem:[%s1684_s21 + $0x48] sm:$0xff]  ;;  %v1787_v40 = vld [vmem:[%s1684_s21 + $0x50] sm:$0xff]  ;;  %v1797_v44 = vld [vmem:[%s1684_s21 + $0x58] sm:$0xff] }
  0x18   : > { %v1780_v37 = vld [vmem:[%s1684_s21 + $0xc8] sm:$0xff]  ;;  %v263_v38 = vsel %vm235_vm0, %v1777_v36, 0.0  ;;  %v1790_v41 = vld [vmem:[%s1684_s21 + $0xd0] sm:$0xff]  ;;  %v266_v42 = vsel %vm235_vm0, %v1787_v40, 0.0  ;;  %v1800_v45 = vld [vmem:[%s1684_s21 + $0xd8] sm:$0xff]  ;;  %v269_v46 = vsel %vm235_vm0, %v1797_v44, 0.0 }
  0x19   : > { %v311_v39 = vsel %vm235_vm0, %v1780_v37, 0.0  ;;  %v314_v43 = vsel %vm235_vm0, %v1790_v41, 0.0  ;;  %v317_v47 = vsel %vm235_vm0, %v1800_v45, 0.0  ;;  %v1807_v48 = vld [vmem:[%s1684_s21 + $0x60] sm:$0xff]  ;;  %v1817_v52 = vld [vmem:[%s1684_s21 + $0x68] sm:$0xff]  ;;  %v1827_v56 = vld [vmem:[%s1684_s21 + $0x70] sm:$0xff] }
  0x1a   : > { %v1810_v49 = vld [vmem:[%s1684_s21 + $0xe0] sm:$0xff]  ;;  %v272_v50 = vsel %vm235_vm0, %v1807_v48, 0.0  ;;  %v1820_v53 = vld [vmem:[%s1684_s21 + $0xe8] sm:$0xff]  ;;  %v275_v54 = vsel %vm235_vm0, %v1817_v52, 0.0  ;;  %v1830_v57 = vld [vmem:[%s1684_s21 + $0xf0] sm:$0xff]  ;;  %v278_v58 = vsel %vm235_vm0, %v1827_v56, 0.0 }
  0x1b   : > { %243 = vadd.xlane.f32.xlu0 %v242_v10  ;;  %291 = vadd.xlane.f32.xlu1 %v290_v11  ;;  %v320_v51 = vsel %vm235_vm0, %v1810_v49, 0.0  ;;  %v323_v55 = vsel %vm235_vm0, %v1820_v53, 0.0  ;;  %v326_v59 = vsel %vm235_vm0, %v1830_v57, 0.0  ;;  %v1837_v60 = vld [vmem:[%s1684_s21 + $0x78] sm:$0xff] }
  0x1c   : > { %v1840_v61 = vld [vmem:[%s1684_s21 + $0xf8] sm:$0xff]  ;;  %v281_v62 = vsel %vm235_vm0, %v1837_v60, 0.0 }
  0x1d   : > { %v329_v63 = vsel %vm235_vm0, %v1840_v61, 0.0 }
  0x1f   : > { %246 = vadd.xlane.f32.xlu0 %v245_v14  ;;  %294 = vadd.xlane.f32.xlu1 %v293_v15 }
  0x23   : > { %249 = vadd.xlane.f32.xlu0 %v248_v18  ;;  %297 = vadd.xlane.f32.xlu1 %v296_v19 }
  0x27   : > { %252 = vadd.xlane.f32.xlu0 %v251_v22  ;;  %300 = vadd.xlane.f32.xlu1 %v299_v23 }
  0x2b   : > { %255 = vadd.xlane.f32.xlu0 %v254_v26  ;;  %303 = vadd.xlane.f32.xlu1 %v302_v27 }
  0x2f   : > { %258 = vadd.xlane.f32.xlu0 %v257_v30  ;;  %306 = vadd.xlane.f32.xlu1 %v305_v31 }
  0x33   : > { %261 = vadd.xlane.f32.xlu0 %v260_v34  ;;  %309 = vadd.xlane.f32.xlu1 %v308_v35 }
  0x37   : > { %264 = vadd.xlane.f32.xlu0 %v263_v38  ;;  %312 = vadd.xlane.f32.xlu1 %v311_v39 }
  0x3b   : > { %267 = vadd.xlane.f32.xlu0 %v266_v42  ;;  %315 = vadd.xlane.f32.xlu1 %v314_v43 }
  0x3f   : > { %270 = vadd.xlane.f32.xlu0 %v269_v46  ;;  %318 = vadd.xlane.f32.xlu1 %v317_v47 }
  0x43   : > { %273 = vadd.xlane.f32.xlu0 %v272_v50  ;;  %321 = vadd.xlane.f32.xlu1 %v320_v51 }
  0x47   : > { %276 = vadd.xlane.f32.xlu0 %v275_v54  ;;  %324 = vadd.xlane.f32.xlu1 %v323_v55 }
  0x4b   : > { %279 = vadd.xlane.f32.xlu0 %v278_v58  ;;  %327 = vadd.xlane.f32.xlu1 %v326_v59 }
  0x4f   : > { %282 = vadd.xlane.f32.xlu0 %v281_v62  ;;  %330 = vadd.xlane.f32.xlu1 %v329_v63 }
  0x9c   : > { %v238_v3 = vpop.xlane.xlu0 %237  ;;  %v241_v4 = vpop.xlane.xlu1 %240 }
  0x9d   : > { %v333_v6 = vmul.f32 0.25, %v238_v3  ;;  %v334_v7 = vmul.f32 0.25, %v241_v4 }
  0x9f   : > { %v1847_v10 = vsub.f32 %v1687_v0, %v333_v6  ;;  %v1850_v11 = vsub.f32 %v1690_v1, %v334_v7 }
  0xa0   : > { %v286_v14 = vpop.xlane.xlu0 %285  ;;  %v289_v15 = vpop.xlane.xlu1 %288 }
  0xa1   : > { %v349_v18 = vmul.f32 0.25, %v286_v14  ;;  %v350_v19 = vmul.f32 0.25, %v289_v15  ;;  %v397_v22 = vmul.f32 %v1847_v10, %v1847_v10  ;;  %v398_v23 = vmul.f32 %v1850_v11, %v1850_v11 }
  0xa3   : > { %v1857_v26 = vsub.f32 %v1693_v2, %v349_v18  ;;  %v1860_v27 = vsub.f32 %v1700_v5, %v350_v19  ;;  %v429_v0 = vsel %vm235_vm0, %v397_v22, 0.0  ;;  %v432_v31 = vsel %vm235_vm0, %v398_v23, 0.0 }
  0xa4   : > { %430 = vadd.xlane.f32.xlu0 %v429_v0  ;;  %v244_v1 = vpop.xlane.xlu0 %243  ;;  %v292_v30 = vpop.xlane.xlu1 %291 }
  0xa5   : > { %v335_v34 = vmul.f32 0.25, %v244_v1  ;;  %v351_v35 = vmul.f32 0.25, %v292_v30  ;;  %v413_v38 = vmul.f32 %v1857_v26, %v1857_v26  ;;  %v414_v39 = vmul.f32 %v1860_v27, %v1860_v27 }
  0xa7   : > { %v1869_v2 = vsub.f32 %v1707_v8, %v335_v34  ;;  %v1872_v5 = vsub.f32 %v1710_v9, %v351_v35  ;;  %v477_v42 = vsel %vm235_vm0, %v413_v38, 0.0  ;;  %v480_v47 = vsel %vm235_vm0, %v414_v39, 0.0 }
  0xa8   : > { %433 = vadd.xlane.f32.xlu0 %v432_v31  ;;  %478 = vadd.xlane.f32.xlu1 %v477_v42  ;;  %v247_v43 = vpop.xlane.xlu0 %246  ;;  %v295_v46 = vpop.xlane.xlu1 %294 }
  0xa9   : > { %v336_v50 = vmul.f32 0.25, %v247_v43  ;;  %v352_v51 = vmul.f32 0.25, %v295_v46  ;;  %v399_v54 = vmul.f32 %v1869_v2, %v1869_v2  ;;  %v415_v8 = vmul.f32 %v1872_v5, %v1872_v5 }
  0xab   : > { %v1881_v55 = vsub.f32 %v1717_v12, %v336_v50  ;;  %v1884_v9 = vsub.f32 %v1720_v13, %v352_v51  ;;  %v435_v58 = vsel %vm235_vm0, %v399_v54, 0.0  ;;  %v483_v63 = vsel %vm235_vm0, %v415_v8, 0.0 }
  0xac   : > { %481 = vadd.xlane.f32.xlu1 %v480_v47  ;;  %436 = vadd.xlane.f32.xlu0 %v435_v58  ;;  %v250_v59 = vpop.xlane.xlu0 %249  ;;  %v298_v62 = vpop.xlane.xlu1 %297 }
  0xad   : > { %v337_v3 = vmul.f32 0.25, %v250_v59  ;;  %v353_v4 = vmul.f32 0.25, %v298_v62  ;;  %v400_v6 = vmul.f32 %v1881_v55, %v1881_v55  ;;  %v416_v12 = vmul.f32 %v1884_v9, %v1884_v9 }
  0xaf   : > { %v1893_v7 = vsub.f32 %v1727_v16, %v337_v3  ;;  %v1896_v13 = vsub.f32 %v1730_v17, %v353_v4  ;;  %v438_v14 = vsel %vm235_vm0, %v400_v6, 0.0  ;;  %v486_v19 = vsel %vm235_vm0, %v416_v12, 0.0 }
  0xb0   : > { %484 = vadd.xlane.f32.xlu1 %v483_v63  ;;  %439 = vadd.xlane.f32.xlu0 %v438_v14  ;;  %v253_v15 = vpop.xlane.xlu0 %252  ;;  %v301_v18 = vpop.xlane.xlu1 %300 }
  0xb1   : > { %v338_v22 = vmul.f32 0.25, %v253_v15  ;;  %v354_v23 = vmul.f32 0.25, %v301_v18  ;;  %v401_v0 = vmul.f32 %v1893_v7, %v1893_v7  ;;  %v417_v16 = vmul.f32 %v1896_v13, %v1896_v13 }
  0xb3   : > { %v1905_v1 = vsub.f32 %v1737_v20, %v338_v22  ;;  %v1908_v17 = vsub.f32 %v1740_v21, %v354_v23  ;;  %v441_v30 = vsel %vm235_vm0, %v401_v0, 0.0  ;;  %v489_v35 = vsel %vm235_vm0, %v417_v16, 0.0 }
  0xb4   : > { %487 = vadd.xlane.f32.xlu1 %v486_v19  ;;  %442 = vadd.xlane.f32.xlu0 %v441_v30  ;;  %v256_v31 = vpop.xlane.xlu0 %255  ;;  %v304_v34 = vpop.xlane.xlu1 %303 }
  0xb5   : > { %v339_v38 = vmul.f32 0.25, %v256_v31  ;;  %v355_v39 = vmul.f32 0.25, %v304_v34  ;;  %v402_v42 = vmul.f32 %v1905_v1, %v1905_v1  ;;  %v418_v20 = vmul.f32 %v1908_v17, %v1908_v17 }
  0xb7   : > { %v1917_v43 = vsub.f32 %v1747_v24, %v339_v38  ;;  %v1920_v21 = vsub.f32 %v1750_v25, %v355_v39  ;;  %v444_v46 = vsel %vm235_vm0, %v402_v42, 0.0  ;;  %v492_v51 = vsel %vm235_vm0, %v418_v20, 0.0 }
  0xb8   : > { %490 = vadd.xlane.f32.xlu1 %v489_v35  ;;  %445 = vadd.xlane.f32.xlu0 %v444_v46  ;;  %v259_v47 = vpop.xlane.xlu0 %258  ;;  %v307_v50 = vpop.xlane.xlu1 %306 }
  0xb9   : > { %v340_v54 = vmul.f32 0.25, %v259_v47  ;;  %v356_v8 = vmul.f32 0.25, %v307_v50  ;;  %v403_v58 = vmul.f32 %v1917_v43, %v1917_v43  ;;  %v419_v24 = vmul.f32 %v1920_v21, %v1920_v21 }
  0xbb   : > { %v1929_v59 = vsub.f32 %v1757_v28, %v340_v54  ;;  %v1932_v25 = vsub.f32 %v1760_v29, %v356_v8  ;;  %v447_v62 = vsel %vm235_vm0, %v403_v58, 0.0  ;;  %v495_v4 = vsel %vm235_vm0, %v419_v24, 0.0 }
  0xbc   : > { %493 = vadd.xlane.f32.xlu1 %v492_v51  ;;  %448 = vadd.xlane.f32.xlu0 %v447_v62  ;;  %v262_v63 = vpop.xlane.xlu0 %261  ;;  %v310_v3 = vpop.xlane.xlu1 %309 }
  0xbd   : > { %v341_v6 = vmul.f32 0.25, %v262_v63  ;;  %v357_v12 = vmul.f32 0.25, %v310_v3  ;;  %v404_v14 = vmul.f32 %v1929_v59, %v1929_v59  ;;  %v420_v28 = vmul.f32 %v1932_v25, %v1932_v25 }
  0xbf   : > { %v1941_v15 = vsub.f32 %v1767_v32, %v341_v6  ;;  %v1944_v29 = vsub.f32 %v1770_v33, %v357_v12  ;;  %v450_v18 = vsel %vm235_vm0, %v404_v14, 0.0  ;;  %v498_v23 = vsel %vm235_vm0, %v420_v28, 0.0 }
  0xc0   : > { %496 = vadd.xlane.f32.xlu1 %v495_v4  ;;  %451 = vadd.xlane.f32.xlu0 %v450_v18  ;;  %v265_v19 = vpop.xlane.xlu0 %264  ;;  %v313_v22 = vpop.xlane.xlu1 %312 }
  0xc1   : > { %v342_v0 = vmul.f32 0.25, %v265_v19  ;;  %v358_v16 = vmul.f32 0.25, %v313_v22  ;;  %v405_v30 = vmul.f32 %v1941_v15, %v1941_v15  ;;  %v421_v32 = vmul.f32 %v1944_v29, %v1944_v29 }
  0xc3   : > { %v1953_v31 = vsub.f32 %v1777_v36, %v342_v0  ;;  %v1956_v33 = vsub.f32 %v1780_v37, %v358_v16  ;;  %v453_v34 = vsel %vm235_vm0, %v405_v30, 0.0  ;;  %v501_v39 = vsel %vm235_vm0, %v421_v32, 0.0 }
  0xc4   : > { %499 = vadd.xlane.f32.xlu1 %v498_v23  ;;  %454 = vadd.xlane.f32.xlu0 %v453_v34  ;;  %v268_v35 = vpop.xlane.xlu0 %267  ;;  %v316_v38 = vpop.xlane.xlu1 %315 }
  0xc5   : > { %v343_v42 = vmul.f32 0.25, %v268_v35  ;;  %v359_v20 = vmul.f32 0.25, %v316_v38  ;;  %v406_v46 = vmul.f32 %v1953_v31, %v1953_v31  ;;  %v422_v36 = vmul.f32 %v1956_v33, %v1956_v33 }
  0xc7   : > { %v1965_v47 = vsub.f32 %v1787_v40, %v343_v42  ;;  %v1968_v37 = vsub.f32 %v1790_v41, %v359_v20  ;;  %v456_v50 = vsel %vm235_vm0, %v406_v46, 0.0  ;;  %v504_v8 = vsel %vm235_vm0, %v422_v36, 0.0 }
  0xc8   : > { %502 = vadd.xlane.f32.xlu1 %v501_v39  ;;  %457 = vadd.xlane.f32.xlu0 %v456_v50  ;;  %v271_v51 = vpop.xlane.xlu0 %270  ;;  %v319_v54 = vpop.xlane.xlu1 %318 }
  0xc9   : > { %v344_v58 = vmul.f32 0.25, %v271_v51  ;;  %v360_v24 = vmul.f32 0.25, %v319_v54  ;;  %v407_v62 = vmul.f32 %v1965_v47, %v1965_v47  ;;  %v423_v40 = vmul.f32 %v1968_v37, %v1968_v37 }
  0xcb   : > { %v1977_v63 = vsub.f32 %v1797_v44, %v344_v58  ;;  %v1980_v41 = vsub.f32 %v1800_v45, %v360_v24  ;;  %v459_v3 = vsel %vm235_vm0, %v407_v62, 0.0  ;;  %v507_v12 = vsel %vm235_vm0, %v423_v40, 0.0 }
  0xcc   : > { %505 = vadd.xlane.f32.xlu1 %v504_v8  ;;  %460 = vadd.xlane.f32.xlu0 %v459_v3  ;;  %v274_v4 = vpop.xlane.xlu0 %273  ;;  %v322_v6 = vpop.xlane.xlu1 %321 }
  0xcd   : > { %v345_v14 = vmul.f32 0.25, %v274_v4  ;;  %v361_v28 = vmul.f32 0.25, %v322_v6  ;;  %v408_v18 = vmul.f32 %v1977_v63, %v1977_v63  ;;  %v424_v44 = vmul.f32 %v1980_v41, %v1980_v41 }
  0xcf   : > { %v1989_v19 = vsub.f32 %v1807_v48, %v345_v14  ;;  %v1992_v45 = vsub.f32 %v1810_v49, %v361_v28  ;;  %v462_v22 = vsel %vm235_vm0, %v408_v18, 0.0  ;;  %v510_v16 = vsel %vm235_vm0, %v424_v44, 0.0 }
  0xd0   : > { %508 = vadd.xlane.f32.xlu1 %v507_v12  ;;  %463 = vadd.xlane.f32.xlu0 %v462_v22  ;;  %v277_v23 = vpop.xlane.xlu0 %276  ;;  %v325_v0 = vpop.xlane.xlu1 %324 }
  0xd1   : > { %v346_v30 = vmul.f32 0.25, %v277_v23  ;;  %v362_v32 = vmul.f32 0.25, %v325_v0  ;;  %v409_v34 = vmul.f32 %v1989_v19, %v1989_v19  ;;  %v425_v48 = vmul.f32 %v1992_v45, %v1992_v45 }
  0xd3   : > { %v2001_v35 = vsub.f32 %v1817_v52, %v346_v30  ;;  %v2004_v49 = vsub.f32 %v1820_v53, %v362_v32  ;;  %v465_v38 = vsel %vm235_vm0, %v409_v34, 0.0  ;;  %v513_v20 = vsel %vm235_vm0, %v425_v48, 0.0 }
  0xd4   : > { %511 = vadd.xlane.f32.xlu1 %v510_v16  ;;  %466 = vadd.xlane.f32.xlu0 %v465_v38  ;;  %v280_v39 = vpop.xlane.xlu0 %279  ;;  %v328_v42 = vpop.xlane.xlu1 %327 }
  0xd5   : > { %2698 = vst [vmem:[#allocation2_spill] sm:$0xff] %v2004_v49  ;;  %v347_v46 = vmul.f32 0.25, %v280_v39  ;;  %v363_v36 = vmul.f32 0.25, %v328_v42  ;;  %v410_v50 = vmul.f32 %v2001_v35, %v2001_v35  ;;  %v426_v52 = vmul.f32 %v2004_v49, %v2004_v49 }
  0xd7   : > { %v2013_v51 = vsub.f32 %v1827_v56, %v347_v46  ;;  %v2016_v53 = vsub.f32 %v1830_v57, %v363_v36  ;;  %v468_v54 = vsel %vm235_vm0, %v410_v50, 0.0  ;;  %v516_v24 = vsel %vm235_vm0, %v426_v52, 0.0 }
  0xd8   : > { %514 = vadd.xlane.f32.xlu1 %v513_v20  ;;  %469 = vadd.xlane.f32.xlu0 %v468_v54  ;;  %v283_v8 = vpop.xlane.xlu0 %282  ;;  %v331_v58 = vpop.xlane.xlu1 %330 }
  0xd9   : > { %2699 = vst [vmem:[#allocation3_spill] sm:$0xff] %v2013_v51  ;;  %2700 = vst [vmem:[#allocation4_spill] sm:$0xff] %v2016_v53  ;;  %v348_v62 = vmul.f32 0.25, %v283_v8  ;;  %v364_v40 = vmul.f32 0.25, %v331_v58  ;;  %v411_v3 = vmul.f32 %v2013_v51, %v2013_v51  ;;  %v427_v56 = vmul.f32 %v2016_v53, %v2016_v53 }
  0xdb   : > { %v2025_v4 = vsub.f32 %v1837_v60, %v348_v62  ;;  %v2028_v57 = vsub.f32 %v1840_v61, %v364_v40  ;;  %v471_v6 = vsel %vm235_vm0, %v411_v3, 0.0  ;;  %v519_v12 = vsel %vm235_vm0, %v427_v56, 0.0  ;;  %v953_v61 = vld [vmem:[%s2691_s3] sm:$0xf] }
  0xdc   : > { %517 = vadd.xlane.f32.xlu1 %v516_v24  ;;  %472 = vadd.xlane.f32.xlu0 %v471_v6 }
  0xdd   : > { %2701 = vst [vmem:[#allocation5_spill] sm:$0xff] %v2025_v4  ;;  %2702 = vst [vmem:[#allocation6_spill] sm:$0xff] %v2028_v57  ;;  %v412_v14 = vmul.f32 %v2025_v4, %v2025_v4  ;;  %v428_v28 = vmul.f32 %v2028_v57, %v2028_v57  ;;  %1447 = vmatprep.subr.msk.mxu0 %vm1050_vm1, %v953_v61  ;;  %1497 = vmatprep.subr.msk.mxu1 %vm1050_vm1, %v953_v61 }
  0xde   : > { %1448 = vmatpush3.msk.msra.mxu0 %vm1050_vm1, %v953_v61  ;;  %1498 = vmatpush3.msk.msra.mxu1 %vm1050_vm1, %v953_v61 }
  0xdf   : > { %v474_v18 = vsel %vm235_vm0, %v412_v14, 0.0  ;;  %v522_v60 = vsel %vm235_vm0, %v428_v28, 0.0 }
  0xe0   : > { %520 = vadd.xlane.f32.xlu1 %v519_v12  ;;  %475 = vadd.xlane.f32.xlu0 %v474_v18 }
  0xe4   : > { %523 = vadd.xlane.f32.xlu1 %v522_v60 }
 0x12d   : > { %v431_v44 = vpop.xlane.xlu0 %430 }
 0x12e   : > { %v525_v22 = vmul.f32 0.25, %v431_v44 }
 0x130   : > { %v2041_v23 = vadd.f32 1e-05, %v525_v22 }
 0x131   : > { %v479_v0 = vpop.xlane.xlu1 %478  ;;  %v434_v16 = vpop.xlane.xlu0 %433 }
 0x132   : > { %1507 = vrsqrt.f32 %v2041_v23  ;;  %v526_v30 = vmul.f32 0.25, %v434_v16  ;;  %v541_v32 = vmul.f32 0.25, %v479_v0  ;;  %vm591_vm2 = vcmp.eq.f32.partialorder %v2041_v23, inf }
 0x133   : > { %vm593_vm3 = vcmp.eq.f32.partialorder %v2041_v23, 0.0  ;;  %v594_v61 = vand.u32 2147483648, %v2041_v23 }
 0x134   : > { %v2044_v34 = vadd.f32 1e-05, %v526_v30  ;;  %v2047_v20 = vadd.f32 1e-05, %v541_v32 }
 0x135   : > { %v482_v48 = vpop.xlane.xlu1 %481  ;;  %v437_v38 = vpop.xlane.xlu0 %436 }
 0x136   : > { %v542_v39 = vmul.f32 0.25, %v482_v48  ;;  %v527_v42 = vmul.f32 0.25, %v437_v38  ;;  %1509 = vrsqrt.f32 %v2044_v34  ;;  %v706_v44 = vand.u32 2147483648, %v2047_v20 }
 0x137   : > { %vm598_vm4 = vcmp.eq.f32.partialorder %v2044_v34, inf  ;;  %vm600_vm5 = vcmp.eq.f32.partialorder %v2044_v34, 0.0  ;;  %v601_v16 = vand.u32 2147483648, %v2044_v34  ;;  %vm703_vm12 = vcmp.eq.f32.partialorder %v2047_v20, inf }
 0x138   : > { %v2049_v46 = vadd.f32 1e-05, %v542_v39  ;;  %v2051_v36 = vadd.f32 1e-05, %v527_v42  ;;  %vm705_vm1 = vcmp.eq.f32.partialorder %v2047_v20, 0.0 }
 0x139   : > { %v485_v50 = vpop.xlane.xlu1 %484  ;;  %v440_v52 = vpop.xlane.xlu0 %439 }
 0x13a   : > { %v543_v54 = vmul.f32 0.25, %v485_v50  ;;  %v528_v8 = vmul.f32 0.25, %v440_v52  ;;  %1511 = vrsqrt.f32 %v2049_v46  ;;  %vm710_vm6 = vcmp.eq.f32.partialorder %v2049_v46, inf }
 0x13b   : > { %1513 = vrsqrt.f32 %v2051_v36  ;;  %vm712_vm7 = vcmp.eq.f32.partialorder %v2049_v46, 0.0  ;;  %v713_v30 = vand.u32 2147483648, %v2049_v46  ;;  %vm605_vm8 = vcmp.eq.f32.partialorder %v2051_v36, inf }
 0x13c   : > { %1515 = vrsqrt.f32 %v2047_v20  ;;  %v2056_v58 = vadd.f32 1e-05, %v543_v54  ;;  %v2058_v24 = vadd.f32 1e-05, %v528_v8  ;;  %vm607_vm9 = vcmp.eq.f32.partialorder %v2051_v36, 0.0 }
 0x13d   : > { %v488_v62 = vpop.xlane.xlu1 %487  ;;  %v443_v40 = vpop.xlane.xlu0 %442  ;;  %v608_v54 = vand.u32 2147483648, %v2051_v36 }
 0x13e   : > { %v544_v3 = vmul.f32 0.25, %v488_v62  ;;  %v529_v56 = vmul.f32 0.25, %v443_v40  ;;  %1517 = vrsqrt.f32 %v2056_v58  ;;  %vm717_vm10 = vcmp.eq.f32.partialorder %v2056_v58, inf }
 0x13f   : > { %v1508_v6 = vpop.eup %1507  ;;  %1519 = vrsqrt.f32 %v2058_v24  ;;  %vm719_vm11 = vcmp.eq.f32.partialorder %v2056_v58, 0.0  ;;  %vm612_vm13 = vcmp.eq.f32.partialorder %v2058_v24, inf  ;;  %vm614_vm14 = vcmp.eq.f32.partialorder %v2058_v24, 0.0 }
 0x140   : > { %v590_v12 = vmul.f32 %v1508_v6, %v2041_v23  ;;  %v2065_v14 = vadd.f32 1e-05, %v544_v3  ;;  %v2067_v28 = vadd.f32 1e-05, %v529_v56  ;;  %v720_v56 = vand.u32 2147483648, %v2056_v58 }
 0x141   : > { %v491_v18 = vpop.xlane.xlu1 %490  ;;  %v446_v60 = vpop.xlane.xlu0 %445 }
 0x142   : > { %v545_v22 = vmul.f32 0.25, %v491_v18  ;;  %v530_v0 = vmul.f32 0.25, %v446_v60  ;;  %1521 = vrsqrt.f32 %v2065_v14  ;;  %v592_v48 = vsel %vm591_vm2, %v2041_v23, %v590_v12 }
 0x143   : > { %1523 = vrsqrt.f32 %v2067_v28  ;;  %v1510_v32 = vpop.eup %1509  ;;  %v595_v6 = vsel %vm593_vm3, %v594_v61, %v592_v48  ;;  %v615_v60 = vand.u32 2147483648, %v2058_v24  ;;  %vm724_vm15 = vcmp.eq.f32.partialorder %v2065_v14, inf }
 0x144   : > { %v2083_v38 = vadd.f32 1e-05, %v545_v22  ;;  %v2085_v39 = vadd.f32 1e-05, %v530_v0  ;;  %v597_v52 = vmul.f32 %v1510_v32, %v2044_v34  ;;  %vm726_vm2 = vcmp.eq.f32.partialorder %v2065_v14, 0.0 }
 0x145   : > { %v494_v42 = vpop.xlane.xlu1 %493  ;;  %v449_v50 = vpop.xlane.xlu0 %448  ;;  %vm619_vm3 = vcmp.eq.f32.partialorder %v2067_v28, inf }
 0x146   : > { %v546_v8 = vmul.f32 0.25, %v494_v42  ;;  %1525 = vrsqrt.f32 %v2083_v38  ;;  %v531_v62 = vmul.f32 0.25, %v449_v50  ;;  %v599_v3 = vsel %vm598_vm4, %v2044_v34, %v597_v52 }
 0x147   : > { %v1512_v40 = vpop.eup %1511  ;;  %1527 = vrsqrt.f32 %v2085_v39  ;;  %v602_v42 = vsel %vm600_vm5, %v601_v16, %v599_v3  ;;  %vm621_vm4 = vcmp.eq.f32.partialorder %v2067_v28, 0.0  ;;  %vm731_vm5 = vcmp.eq.f32.partialorder %v2083_v38, inf }
 0x148   : > { %v1514_v12 = vpop.eup %1513  ;;  %v709_v18 = vmul.f32 %v1512_v40, %v2049_v46  ;;  %v2109_v23 = vadd.f32 1e-05, %v546_v8  ;;  %v2114_v48 = vadd.f32 1e-05, %v531_v62  ;;  %1529 = vrcp.f32 %v595_v6 }
 0x149   : > { %v497_v22 = vpop.xlane.xlu1 %496  ;;  %v452_v0 = vpop.xlane.xlu0 %451  ;;  %v604_v50 = vmul.f32 %v1514_v12, %v2051_v36  ;;  %v727_v6 = vand.u32 2147483648, %v2065_v14 }
 0x14a   : > { %v1516_v32 = vpop.eup %1515  ;;  %v711_v61 = vsel %vm710_vm6, %v2049_v46, %v709_v18  ;;  %v547_v52 = vmul.f32 0.25, %v497_v22  ;;  %1531 = vrsqrt.f32 %v2109_v23  ;;  %v532_v8 = vmul.f32 0.25, %v452_v0 }
 0x14b   : > { %v1518_v40 = vpop.eup %1517  ;;  %v714_v34 = vsel %vm712_vm7, %v713_v30, %v711_v61  ;;  %v606_v16 = vsel %vm605_vm8, %v2051_v36, %v604_v50  ;;  %v702_v12 = vmul.f32 %v1516_v32, %v2047_v20  ;;  %1533 = vrcp.f32 %v602_v42 }
 0x14c   : > { %v1520_v3 = vpop.eup %1519  ;;  %v716_v62 = vmul.f32 %v1518_v40, %v2056_v58  ;;  %1535 = vrcp.f32 %v714_v34  ;;  %v609_v30 = vsel %vm607_vm9, %v608_v54, %v606_v16  ;;  %v622_v32 = vand.u32 2147483648, %v2067_v28 }
 0x14d   : > { %v500_v18 = vpop.xlane.xlu1 %499  ;;  %v455_v46 = vpop.xlane.xlu0 %454  ;;  %v611_v22 = vmul.f32 %v1520_v3, %v2058_v24  ;;  %1537 = vrsqrt.f32 %v2114_v48  ;;  %v2142_v54 = vadd.f32 1e-05, %v547_v52  ;;  %v2144_v61 = vadd.f32 1e-05, %v532_v8 }
 0x14e   : > { %v718_v0 = vsel %vm717_vm10, %v2056_v58, %v716_v62  ;;  %v704_v34 = vsel %vm703_vm12, %v2047_v20, %v702_v12  ;;  %1539 = vrcp.f32 %v609_v30  ;;  %v548_v3 = vmul.f32 0.25, %v500_v18 }
 0x14f   : > { %v1522_v42 = vpop.eup %1521  ;;  %v721_v50 = vsel %vm719_vm11, %v720_v56, %v718_v0  ;;  %v613_v36 = vsel %vm612_vm13, %v2058_v24, %v611_v22  ;;  %vm733_vm6 = vcmp.eq.f32.partialorder %v2083_v38, 0.0  ;;  %v734_v12 = vand.u32 2147483648, %v2083_v38 }
 0x150   : > { %v1524_v40 = vpop.eup %1523  ;;  %v723_v16 = vmul.f32 %v1522_v42, %v2065_v14  ;;  %1541 = vrcp.f32 %v721_v50  ;;  %v616_v56 = vsel %vm614_vm14, %v615_v60, %v613_v36  ;;  %vm626_vm7 = vcmp.eq.f32.partialorder %v2085_v39, inf }
 0x151   : > { %v503_v58 = vpop.xlane.xlu1 %502  ;;  %v618_v52 = vmul.f32 %v1524_v40, %v2067_v28  ;;  %1543 = vrsqrt.f32 %v2142_v54  ;;  %v458_v62 = vpop.xlane.xlu0 %457  ;;  %vm628_vm8 = vcmp.eq.f32.partialorder %v2085_v39, 0.0  ;;  %v629_v22 = vand.u32 2147483648, %v2085_v39 }
 0x152   : > { %v725_v8 = vsel %vm724_vm15, %v2065_v14, %v723_v16  ;;  %1545 = vrsqrt.f32 %v2144_v61  ;;  %v2172_v42 = vsel %vm705_vm1, %v706_v44, %v704_v34  ;;  %v2177_v40 = vadd.f32 1e-05, %v548_v3 }
 0x153   : > { %v1526_v30 = vpop.eup %1525  ;;  %v620_v24 = vsel %vm619_vm3, %v2067_v28, %v618_v52  ;;  %1547 = vrcp.f32 %v616_v56  ;;  %v728_v50 = vsel %vm726_vm2, %v727_v6, %v725_v8  ;;  %v533_v16 = vmul.f32 0.25, %v455_v46 }
 0x154   : > { %v1528_v60 = vpop.eup %1527  ;;  %v730_v18 = vmul.f32 %v1526_v30, %v2083_v38  ;;  %v623_v56 = vsel %vm621_vm4, %v622_v32, %v620_v24  ;;  %v549_v30 = vmul.f32 0.25, %v503_v58  ;;  %v534_v57 = vmul.f32 0.25, %v458_v62 }
 0x155   : > { %v506_v0 = vpop.xlane.xlu1 %505  ;;  %v625_v36 = vmul.f32 %v1528_v60, %v2085_v39  ;;  %v1530_v20 = vpop.eup %1529  ;;  %1549 = vrsqrt.f32 %v2177_v40  ;;  %vm738_vm9 = vcmp.eq.f32.partialorder %v2109_v23, inf  ;;  %vm740_vm10 = vcmp.eq.f32.partialorder %v2109_v23, 0.0 }
 0x156   : > { %v732_v52 = vsel %vm731_vm5, %v2083_v38, %v730_v18  ;;  %v550_v6 = vmul.f32 0.25, %v506_v0  ;;  %1551 = vrcp.f32 %v728_v50  ;;  %v741_v28 = vand.u32 2147483648, %v2109_v23  ;;  %v461_v32 = vpop.xlane.xlu0 %460 }
 0x157   : > { %v735_v44 = vsel %vm733_vm6, %v734_v12, %v732_v52  ;;  %v627_v14 = vsel %vm626_vm7, %v2085_v39, %v625_v36  ;;  %v1532_v46 = vpop.eup %1531  ;;  %1553 = vrcp.f32 %v623_v56  ;;  %v2194_v58 = vadd.f32 1e-05, %v533_v16 }
 0x158   : > { %v1534_v34 = vpop.eup %1533  ;;  %v737_v38 = vmul.f32 %v1532_v46, %v2109_v23  ;;  %v2196_v3 = vadd.f32 1e-05, %v549_v30  ;;  %1555 = vrcp.f32 %v735_v44  ;;  %v630_v12 = vsel %vm628_vm8, %v629_v22, %v627_v14 }
 0x159   : > { %v2198_v8 = vpop.eup %1535  ;;  %vm633_vm11 = vcmp.eq.f32.partialorder %v2114_v48, inf  ;;  %v2203_v62 = vadd.f32 1e-05, %v534_v57  ;;  %vm635_vm12 = vcmp.eq.f32.partialorder %v2114_v48, 0.0  ;;  %1557 = vrsqrt.f32 %v2194_v58  ;;  %v509_v16 = vpop.xlane.xlu1 %508 }
 0x15a   : > { %v1538_v24 = vpop.eup %1537  ;;  %v739_v60 = vsel %vm738_vm9, %v2109_v23, %v737_v38  ;;  %v2208_v18 = vadd.f32 1e-05, %v550_v6  ;;  %v636_v50 = vand.u32 2147483648, %v2114_v48  ;;  %vm745_vm13 = vcmp.eq.f32.partialorder %v2142_v54, inf  ;;  %v2231_v23 = vld [vmem:[%s2689_s1] ss:$0 sm:$0xff]  ;;  %v464_v44 = vpop.xlane.xlu0 %463 }
 0x15b   : > { %v632_v0 = vmul.f32 %v1538_v24, %v2114_v48  ;;  %1559 = vrsqrt.f32 %v2196_v3  ;;  %v2214_v39 = vpop.eup %1539  ;;  %v742_v57 = vsel %vm740_vm10, %v741_v28, %v739_v60  ;;  %vm747_vm14 = vcmp.eq.f32.partialorder %v2142_v54, 0.0 }
 0x15c   : > { %1561 = vrcp.f32 %v630_v12  ;;  %v535_v22 = vmul.f32 0.25, %v461_v32  ;;  %v814_v36 = vmul.f32 %v1530_v20, %v1847_v10  ;;  %v748_v30 = vand.u32 2147483648, %v2142_v54 }
 0x15d   : > { %v2220_v56 = vpop.eup %1541  ;;  %v634_v52 = vsel %vm633_vm11, %v2114_v48, %v632_v0  ;;  %vm640_vm15 = vcmp.eq.f32.partialorder %v2144_v61, inf  ;;  %1563 = vrsqrt.f32 %v2203_v62  ;;  %vm642_vm1 = vcmp.eq.f32.partialorder %v2144_v61, 0.0  ;;  %v2252_v48 = vld [vmem:[%s2690_s2] ss:$0 sm:$0xff] }
 0x15e   : > { %v1544_v10 = vpop.eup %1543  ;;  %v643_v20 = vand.u32 2147483648, %v2144_v61  ;;  %vm752_vm2 = vcmp.eq.f32.partialorder %v2177_v40, inf  ;;  %1565 = vrsqrt.f32 %v2208_v18  ;;  %v637_v6 = vsel %vm635_vm12, %v636_v50, %v634_v52 }
 0x15f   : > { %v1546_v14 = vpop.eup %1545  ;;  %1567 = vrcp.f32 %v742_v57  ;;  %v744_v46 = vmul.f32 %v1544_v10, %v2142_v54  ;;  %v755_v28 = vand.u32 2147483648, %v2177_v40  ;;  %vm754_vm3 = vcmp.eq.f32.partialorder %v2177_v40, 0.0 }
 0x160   : > { %v2241_v32 = vpop.eup %1547  ;;  %v639_v38 = vmul.f32 %v1546_v14, %v2144_v61  ;;  %v2245_v12 = vadd.f32 1e-05, %v535_v22  ;;  %v883_v24 = vmul.f32 %v2231_v23, %v814_v36  ;;  %v551_v60 = vmul.f32 0.25, %v509_v16  ;;  %v512_v36 = vpop.xlane.xlu1 %511 }
 0x161   : > { %vm647_vm4 = vcmp.eq.f32.partialorder %v2194_v58, inf  ;;  %v536_v0 = vmul.f32 0.25, %v464_v44  ;;  %v816_v50 = vmul.f32 %v1534_v34, %v1850_v11  ;;  %1569 = vrcp.f32 %v2172_v42  ;;  %v467_v42 = vpop.xlane.xlu0 %466 }
 0x162   : > { %v746_v57 = vsel %vm745_vm13, %v2142_v54, %v744_v46  ;;  %vm649_vm5 = vcmp.eq.f32.partialorder %v2194_v58, 0.0  ;;  %v650_v22 = vand.u32 2147483648, %v2194_v58  ;;  %1571 = vrsqrt.f32 %v2245_v12  ;;  %v1550_v16 = vpop.eup %1549 }
 0x163   : > { %1573 = vrcp.f32 %v637_v6  ;;  %vm759_vm6 = vcmp.eq.f32.partialorder %v2196_v3, inf  ;;  %vm761_vm7 = vcmp.eq.f32.partialorder %v2196_v3, 0.0  ;;  %v762_v11 = vand.u32 2147483648, %v2196_v3  ;;  %v2265_v34 = vpop.eup %1551 }
 0x164   : > { %v641_v52 = vsel %vm640_vm15, %v2144_v61, %v639_v38  ;;  %v751_v44 = vmul.f32 %v1550_v16, %v2177_v40  ;;  %vm654_vm8 = vcmp.eq.f32.partialorder %v2203_v62, inf  ;;  %v921_v10 = vadd.f32 %v2252_v48, %v883_v24  ;;  %v2275_v6 = vpop.eup %1553 }
 0x165   : > { %v2273_v14 = vadd.f32 1e-05, %v551_v60  ;;  %v749_v46 = vsel %vm747_vm14, %v748_v30, %v746_v57  ;;  %v2279_v4 = vadd.f32 1e-05, %v536_v0  ;;  %v884_v53 = vmul.f32 %v2231_v23, %v816_v50  ;;  %v2282_v49 = vpop.eup %1555 }
 0x166   : > { %v552_v51 = vmul.f32 0.25, %v512_v36  ;;  %v753_v38 = vsel %vm752_vm2, %v2177_v40, %v751_v44  ;;  %vm656_vm9 = vcmp.eq.f32.partialorder %v2203_v62, 0.0  ;;  %1449 = vmatprep.mubr.msk.f32.mxu0 %vm235_vm0, %v921_v10  ;;  %v537_v24 = vmul.f32 0.25, %v467_v42  ;;  %v1558_v54 = vpop.eup %1557  ;;  %v515_v40 = vpop.xlane.xlu1 %514 }
 0x167   : > { %1575 = vrsqrt.f32 %v2273_v14  ;;  %v644_v30 = vsel %vm642_vm1, %v643_v20, %v641_v52  ;;  %v657_v60 = vand.u32 2147483648, %v2203_v62  ;;  %vm766_vm10 = vcmp.eq.f32.partialorder %v2208_v18, inf }
 0x168   : > { %1577 = vrsqrt.f32 %v2279_v4  ;;  %v1560_v0 = vpop.eup %1559  ;;  %v646_v50 = vmul.f32 %v1558_v54, %v2194_v58  ;;  %vm768_vm11 = vcmp.eq.f32.partialorder %v2208_v18, 0.0  ;;  %v769_v57 = vand.u32 2147483648, %v2208_v18 }
 0x169   : > { %1579 = vrcp.f32 %v749_v46  ;;  %v2298_v36 = vpop.eup %1561  ;;  %v756_v61 = vsel %vm754_vm3, %v755_v28, %v753_v38  ;;  %v758_v20 = vmul.f32 %v1560_v0, %v2196_v3  ;;  %vm661_vm12 = vcmp.eq.f32.partialorder %v2245_v12, inf }
 0x16a   : > { %v922_v16 = vadd.f32 %v2252_v48, %v884_v53  ;;  %v2305_v42 = vadd.f32 1e-05, %v552_v51  ;;  %v1564_v52 = vpop.eup %1563  ;;  %1581 = vrcp.f32 %v644_v30  ;;  %v648_v44 = vsel %vm647_vm4, %v2194_v58, %v646_v50 }
 0x16b   : > { %v664_v10 = vand.u32 2147483648, %v2245_v12  ;;  %v2311_v46 = vadd.f32 1e-05, %v537_v24  ;;  %v1566_v28 = vpop.eup %1565  ;;  %v651_v38 = vsel %vm649_vm5, %v650_v22, %v648_v44  ;;  %v760_v51 = vsel %vm759_vm6, %v2196_v3, %v758_v20  ;;  %v470_v22 = vpop.xlane.xlu0 %469 }
 0x16c   : > { %v653_v53 = vmul.f32 %v1564_v52, %v2203_v62  ;;  %1450 = vmatmul.mubr.msk.f32.vlgmr.msra.gmra.mxu0 %vm235_vm0, %v922_v16  ;;  %1583 = vrsqrt.f32 %v2305_v42  ;;  %v2321_v54 = vpop.eup %1567  ;;  %v763_v24 = vsel %vm761_vm7, %v762_v11, %v760_v51  ;;  %v765_v30 = vmul.f32 %v1566_v28, %v2208_v18  ;;  %v518_v51 = vpop.xlane.xlu1 %517 }
 0x16d   : > { %1585 = vrcp.f32 %v756_v61  ;;  %vm663_vm13 = vcmp.eq.f32.partialorder %v2245_v12, 0.0  ;;  %v818_v58 = vmul.f32 %v2214_v39, %v1869_v2  ;;  %v848_v50 = vmul.f32 %v2198_v8, %v1860_v27 }
 0x16e   : > { %1587 = vrcp.f32 %v651_v38  ;;  %v655_v0 = vsel %vm654_vm8, %v2203_v62, %v653_v53  ;;  %v553_v61 = vmul.f32 0.25, %v515_v40  ;;  %v1570_v20 = vpop.eup %1569  ;;  %v767_v11 = vsel %vm766_vm10, %v2208_v18, %v765_v30 }
 0x16f   : > { %v658_v3 = vsel %vm656_vm9, %v657_v60, %v655_v0  ;;  %vm773_vm14 = vcmp.eq.f32.partialorder %v2273_v14, inf  ;;  %1589 = vrsqrt.f32 %v2311_v46  ;;  %v1572_v2 = vpop.eup %1571  ;;  %vm775_vm15 = vcmp.eq.f32.partialorder %v2273_v14, 0.0  ;;  %v473_v53 = vpop.xlane.xlu0 %472 }
 0x170   : > { %1591 = vrcp.f32 %v763_v24  ;;  %v776_v39 = vand.u32 2147483648, %v2273_v14  ;;  %v846_v27 = vmul.f32 %v1570_v20, %v1857_v26  ;;  %v2344_v8 = vpop.eup %1573  ;;  %v770_v62 = vsel %vm768_vm11, %v769_v57, %v767_v11 }
 0x171   : > { %1593 = vrcp.f32 %v658_v3  ;;  %v660_v60 = vmul.f32 %v1572_v2, %v2245_v12  ;;  %v885_v16 = vmul.f32 %v2231_v23, %v818_v58  ;;  %v900_v44 = vmul.f32 %v2231_v23, %v848_v50 }
 0x172   : > { %v899_v52 = vmul.f32 %v2231_v23, %v846_v27  ;;  %v2352_v40 = vadd.f32 1e-05, %v553_v61  ;;  %v538_v28 = vmul.f32 0.25, %v470_v22  ;;  %v820_v18 = vmul.f32 %v2241_v32, %v1881_v55 }
 0x173   : > { %v662_v26 = vsel %vm661_vm12, %v2245_v12, %v660_v60  ;;  %v923_v38 = vadd.f32 %v2252_v48, %v885_v16  ;;  %v850_v57 = vmul.f32 %v2220_v56, %v1872_v5  ;;  %vm668_vm1 = vcmp.eq.f32.partialorder %v2279_v4, inf  ;;  %v521_v16 = vpop.xlane.xlu1 %520 }
 0x174   : > { %v1576_v24 = vpop.eup %1575  ;;  %v937_v30 = vadd.f32 %v2252_v48, %v899_v52  ;;  %v938_v58 = vadd.f32 %v2252_v48, %v900_v44  ;;  %1595 = vrsqrt.f32 %v2352_v40  ;;  %vm670_vm2 = vcmp.eq.f32.partialorder %v2279_v4, 0.0  ;;  %v476_v52 = vpop.xlane.xlu0 %475 }
 0x175   : > { %v1578_v22 = vpop.eup %1577  ;;  %1597 = vrcp.f32 %v770_v62  ;;  %v772_v0 = vmul.f32 %v1576_v24, %v2273_v14  ;;  %v671_v55 = vand.u32 2147483648, %v2279_v4  ;;  %1452 = vmatprep.mubr.msk.f32.mxu0 %vm235_vm0, %v923_v38  ;;  %v665_v56 = vsel %vm663_vm13, %v664_v10, %v662_v26 }
 0x176   : > { %v2370_v5 = vpop.eup %1579  ;;  %v667_v32 = vmul.f32 %v1578_v22, %v2279_v4  ;;  %1473 = vmatprep.mubr.msk.f32.mxu1 %vm235_vm0, %v937_v30  ;;  %v2376_v50 = vadd.f32 1e-05, %v538_v28  ;;  %v886_v61 = vmul.f32 %v2231_v23, %v820_v18  ;;  %v901_v3 = vmul.f32 %v2231_v23, %v850_v57 }
 0x177   : > { %v774_v20 = vsel %vm773_vm14, %v2273_v14, %v772_v0  ;;  %1474 = vmatmul.mubr.msk.f32.vlgmr.msra.gmra.mxu1 %vm235_vm0, %v938_v58  ;;  %v554_v11 = vmul.f32 0.25, %v518_v51  ;;  %v539_v2 = vmul.f32 0.25, %v473_v53  ;;  %v2384_v12 = vpop.eup %1581  ;;  %vm780_vm3 = vcmp.eq.f32.partialorder %v2305_v42, inf }
 0x178   : > { %v777_v10 = vsel %vm775_vm15, %v776_v39, %v774_v20  ;;  %v669_v27 = vsel %vm668_vm1, %v2279_v4, %v667_v32  ;;  %1599 = vrsqrt.f32 %v2376_v50  ;;  %vm782_vm4 = vcmp.eq.f32.partialorder %v2305_v42, 0.0 }
 0x179   : > { %v1584_v62 = vpop.eup %1583  ;;  %1601 = vrcp.f32 %v665_v56  ;;  %v783_v60 = vand.u32 2147483648, %v2305_v42  ;;  %vm675_vm5 = vcmp.eq.f32.partialorder %v2311_v46, inf  ;;  %v924_v44 = vadd.f32 %v2252_v48, %v886_v61 }
 0x17a   : > { %v2396_v14 = vpop.eup %1585  ;;  %1603 = vrcp.f32 %v777_v10  ;;  %v779_v39 = vmul.f32 %v1584_v62, %v2305_v42  ;;  %v939_v28 = vadd.f32 %v2252_v48, %v901_v3  ;;  %v672_v38 = vsel %vm670_vm2, %v671_v55, %v669_v27  ;;  %v524_v62 = vpop.xlane.xlu1 %523 }
 0x17b   : > { %v2401_v26 = vpop.eup %1587  ;;  %v2405_v18 = vadd.f32 1e-05, %v554_v11  ;;  %v2407_v57 = vadd.f32 1e-05, %v539_v2  ;;  %v822_v51 = vmul.f32 %v2275_v6, %v1893_v7  ;;  %1453 = vmatmul.mubr.msk.f32.gmra.mxu0 %vm235_vm0, %v924_v44  ;;  %v852_v4 = vmul.f32 %v2265_v34, %v1884_v9 }
 0x17c   : > { %v1590_v53 = vpop.eup %1589  ;;  %v781_v24 = vsel %vm780_vm3, %v2305_v42, %v779_v39  ;;  %1476 = vmatprep.mubr.msk.f32.mxu1 %vm235_vm0, %v939_v28  ;;  %v555_v30 = vmul.f32 0.25, %v521_v16  ;;  %v540_v58 = vmul.f32 0.25, %v476_v52  ;;  %v824_v6 = vmul.f32 %v2298_v36, %v1905_v1 }
 0x17d   : > { %v2418_v22 = vpop.eup %1591  ;;  %v784_v0 = vsel %vm782_vm4, %v783_v60, %v781_v24  ;;  %v674_v7 = vmul.f32 %v1590_v53, %v2311_v46  ;;  %1605 = vrsqrt.f32 %v2405_v18  ;;  %vm677_vm6 = vcmp.eq.f32.partialorder %v2311_v46, 0.0 }
 0x17e   : > { %v2426_v55 = vpop.eup %1593  ;;  %1607 = vrcp.f32 %v672_v38  ;;  %v678_v9 = vand.u32 2147483648, %v2311_v46  ;;  %vm787_vm7 = vcmp.eq.f32.partialorder %v2352_v40, inf  ;;  %vm789_vm8 = vcmp.eq.f32.partialorder %v2352_v40, 0.0 }
 0x17f   : > { %v676_v34 = vsel %vm675_vm5, %v2311_v46, %v674_v7  ;;  %v790_v42 = vand.u32 2147483648, %v2352_v40  ;;  %1609 = vrsqrt.f32 %v2407_v57  ;;  %v887_v1 = vmul.f32 %v2231_v23, %v822_v51 }
 0x180   : > { %1611 = vrcp.f32 %v784_v0  ;;  %v902_v36 = vmul.f32 %v2231_v23, %v852_v4  ;;  %v2439_v56 = vadd.f32 1e-05, %v555_v30  ;;  %v679_v61 = vsel %vm677_vm6, %v678_v9, %v676_v34 }
 0x181   : > { %v1596_v32 = vpop.eup %1595  ;;  %v2441_v20 = vadd.f32 1e-05, %v540_v58  ;;  %v888_v3 = vmul.f32 %v2231_v23, %v824_v6  ;;  %v854_v46 = vmul.f32 %v2282_v49, %v1896_v13  ;;  %v925_v10 = vadd.f32 %v2252_v48, %v887_v1 }
 0x182   : > { %v2446_v11 = vpop.eup %1597  ;;  %v786_v2 = vmul.f32 %v1596_v32, %v2352_v40  ;;  %v940_v27 = vadd.f32 %v2252_v48, %v902_v36  ;;  %1613 = vrsqrt.f32 %v2439_v56  ;;  %vm682_vm9 = vcmp.eq.f32.partialorder %v2376_v50, inf }
 0x183   : > { %vm684_vm10 = vcmp.eq.f32.partialorder %v2376_v50, 0.0  ;;  %v685_v60 = vand.u32 2147483648, %v2376_v50  ;;  %1615 = vrsqrt.f32 %v2441_v20  ;;  %vm794_vm11 = vcmp.eq.f32.partialorder %v2405_v18, inf  ;;  %1455 = vmatprep.mubr.msk.f32.mxu0 %vm235_vm0, %v925_v10 }
 0x184   : > { %1617 = vrcp.f32 %v679_v61  ;;  %v788_v13 = vsel %vm787_vm7, %v2352_v40, %v786_v2  ;;  %v797_v49 = vand.u32 2147483648, %v2405_v18  ;;  %v692_v16 = vand.u32 2147483648, %v2407_v57  ;;  %1477 = vmatmul.mubr.msk.f32.gmra.mxu1 %vm235_vm0, %v940_v27 }
 0x185   : > { %v1600_v52 = vpop.eup %1599  ;;  %v791_v39 = vsel %vm789_vm8, %v790_v42, %v788_v13  ;;  %vm796_vm12 = vcmp.eq.f32.partialorder %v2405_v18, 0.0  ;;  %v926_v44 = vadd.f32 %v2252_v48, %v888_v3  ;;  %v903_v28 = vmul.f32 %v2231_v23, %v854_v46 }
 0x186   : > { %v556_v38 = vmul.f32 0.25, %v524_v62  ;;  %v1602_v51 = vpop.eup %1601  ;;  %1619 = vrcp.f32 %v791_v39  ;;  %v681_v53 = vmul.f32 %v1600_v52, %v2376_v50  ;;  %vm689_vm13 = vcmp.eq.f32.partialorder %v2407_v57, inf }
 0x187   : > { %v826_v24 = vmul.f32 %v2344_v8, %v1917_v43  ;;  %v856_v40 = vmul.f32 %v2321_v54, %v1908_v17  ;;  %v2475_v4 = vpop.eup %1603  ;;  %vm691_vm14 = vcmp.eq.f32.partialorder %v2407_v57, 0.0  ;;  %1456 = vmatmul.mubr.msk.f32.gmra.mxu0 %vm235_vm0, %v926_v44  ;;  %v941_v30 = vadd.f32 %v2252_v48, %v903_v28 }
 0x188   : > { %v2480_v58 = vadd.f32 1e-05, %v556_v38  ;;  %v828_v0 = vmul.f32 %v2384_v12, %v1929_v59  ;;  %v858_v7 = vmul.f32 %v2370_v5, %v1920_v21  ;;  %v683_v17 = vsel %vm682_vm9, %v2376_v50, %v681_v53 }
 0x189   : > { %v889_v43 = vmul.f32 %v2231_v23, %v826_v24  ;;  %v904_v54 = vmul.f32 %v2231_v23, %v856_v40  ;;  %v830_v8 = vmul.f32 %v2401_v26, %v1941_v15  ;;  %v686_v6 = vsel %vm684_vm10, %v685_v60, %v683_v17  ;;  %1479 = vmatprep.mubr.msk.f32.mxu1 %vm235_vm0, %v941_v30 }
 0x18a   : > { %vm801_vm15 = vcmp.eq.f32.partialorder %v2439_v56, inf  ;;  %v804_v59 = vand.u32 2147483648, %v2439_v56  ;;  %1621 = vrsqrt.f32 %v2480_v58  ;;  %v1606_v21 = vpop.eup %1605  ;;  %vm803_vm1 = vcmp.eq.f32.partialorder %v2439_v56, 0.0 }
 0x18b   : > { %1623 = vrcp.f32 %v686_v6  ;;  %vm696_vm2 = vcmp.eq.f32.partialorder %v2441_v20, inf  ;;  %v927_v5 = vadd.f32 %v2252_v48, %v889_v43  ;;  %v942_v15 = vadd.f32 %v2252_v48, %v904_v54  ;;  %v1608_v50 = vpop.eup %1607 }
 0x18c   : > { %v793_v12 = vmul.f32 %v1606_v21, %v2405_v18  ;;  %v890_v26 = vmul.f32 %v2231_v23, %v828_v0  ;;  %v905_v9 = vmul.f32 %v2231_v23, %v858_v7  ;;  %v891_v34 = vmul.f32 %v2231_v23, %v830_v8  ;;  %v1610_v42 = vpop.eup %1609 }
 0x18d   : > { %v699_v1 = vand.u32 2147483648, %v2441_v20  ;;  %1458 = vmatprep.mubr.msk.f32.mxu0 %vm235_vm0, %v927_v5  ;;  %1480 = vmatmul.mubr.msk.f32.gmra.mxu1 %vm235_vm0, %v942_v15  ;;  %v860_v36 = vmul.f32 %v2396_v14, %v1932_v25  ;;  %v832_v32 = vmul.f32 %v2426_v55, %v1953_v31  ;;  %v862_v61 = vmul.f32 %v2418_v22, %v1944_v29  ;;  %v1612_v3 = vpop.eup %1611 }
 0x18e   : > { %v795_v46 = vsel %vm794_vm11, %v2405_v18, %v793_v12  ;;  %v688_v2 = vmul.f32 %v1610_v42, %v2407_v57  ;;  %v928_v10 = vadd.f32 %v2252_v48, %v890_v26  ;;  %v943_v27 = vadd.f32 %v2252_v48, %v905_v9 }
 0x18f   : > { %v798_v25 = vsel %vm796_vm12, %v797_v49, %v795_v46  ;;  %v929_v14 = vadd.f32 %v2252_v48, %v891_v34  ;;  %v906_v31 = vmul.f32 %v2231_v23, %v860_v36  ;;  %v892_v29 = vmul.f32 %v2231_v23, %v832_v32  ;;  %v1614_v22 = vpop.eup %1613  ;;  %v2704_v36 = vld [vmem:[#allocation3_spill] sm:$0xff] }
 0x190   : > { %1625 = vrcp.f32 %v798_v25  ;;  %v690_v55 = vsel %vm689_vm13, %v2407_v57, %v688_v2  ;;  %1459 = vmatmul.mubr.msk.f32.gmra.mxu0 %vm235_vm0, %v928_v10  ;;  %1482 = vmatprep.mubr.msk.f32.mxu1 %vm235_vm0, %v943_v27  ;;  %v907_v62 = vmul.f32 %v2231_v23, %v862_v61  ;;  %v834_v18 = vmul.f32 %v1602_v51, %v1965_v47  ;;  %v1616_v60 = vpop.eup %1615  ;;  %v2705_v27 = vld [vmem:[#allocation4_spill] sm:$0xff] }
 0x191   : > { %v693_v13 = vsel %vm691_vm14, %v692_v16, %v690_v55  ;;  %v800_v49 = vmul.f32 %v1614_v22, %v2439_v56  ;;  %1461 = vmatprep.mubr.msk.f32.mxu0 %vm235_vm0, %v929_v14  ;;  %v944_v52 = vadd.f32 %v2252_v48, %v906_v31  ;;  %v930_v39 = vadd.f32 %v2252_v48, %v892_v29  ;;  %v1618_v44 = vpop.eup %1617  ;;  %v2706_v31 = vld [vmem:[#allocation5_spill] sm:$0xff] }
 0x192   : > { %1627 = vrcp.f32 %v693_v13  ;;  %v695_v28 = vmul.f32 %v1616_v60, %v2441_v20  ;;  %v945_v47 = vadd.f32 %v2252_v48, %v907_v62  ;;  %v893_v38 = vmul.f32 %v2231_v23, %v834_v18  ;;  %v2707_v13 = vld [vmem:[#allocation6_spill] sm:$0xff] }
 0x193   : > { %v802_v57 = vsel %vm801_vm15, %v2439_v56, %v800_v49  ;;  %1483 = vmatmul.mubr.msk.f32.gmra.mxu1 %vm235_vm0, %v944_v52  ;;  %v864_v16 = vmul.f32 %v2446_v11, %v1956_v33  ;;  %v836_v51 = vmul.f32 %v1608_v50, %v1977_v63  ;;  %v866_v53 = vmul.f32 %v2475_v4, %v1968_v37  ;;  %v1620_v24 = vpop.eup %1619 }
 0x194   : > { %v805_v40 = vsel %vm803_vm1, %v804_v59, %v802_v57  ;;  %v697_v30 = vsel %vm696_vm2, %v2441_v20, %v695_v28  ;;  %vm698_vm3 = vcmp.eq.f32.partialorder %v2441_v20, 0.0  ;;  %1462 = vmatmul.mubr.msk.f32.gmra.mxu0 %vm235_vm0, %v930_v39  ;;  %1485 = vmatprep.mubr.msk.f32.mxu1 %vm235_vm0, %v945_v47  ;;  %v931_v33 = vadd.f32 %v2252_v48, %v893_v38 }
 0x195   : > { %1629 = vrcp.f32 %v805_v40  ;;  %v700_v63 = vsel %vm698_vm3, %v699_v1, %v697_v30  ;;  %v908_v37 = vmul.f32 %v2231_v23, %v864_v16  ;;  %v894_v11 = vmul.f32 %v2231_v23, %v836_v51 }
 0x196   : > { %1631 = vrcp.f32 %v700_v63  ;;  %1464 = vmatprep.mubr.msk.f32.mxu0 %vm235_vm0, %v931_v33  ;;  %v909_v56 = vmul.f32 %v2231_v23, %v866_v53  ;;  %v838_v4 = vmul.f32 %v1618_v44, %v1989_v19  ;;  %v868_v20 = vmul.f32 %v1612_v3, %v1980_v41 }
 0x197   : > { %v1622_v0 = vpop.eup %1621  ;;  %v946_v7 = vadd.f32 %v2252_v48, %v908_v37  ;;  %v932_v17 = vadd.f32 %v2252_v48, %v894_v11  ;;  %v870_v43 = vmul.f32 %v1620_v24, %v1992_v45  ;;  %vm808_vm4 = vcmp.eq.f32.partialorder %v2480_v58, inf }
 0x198   : > { %v1624_v54 = vpop.eup %1623  ;;  %v807_v8 = vmul.f32 %v1622_v0, %v2480_v58  ;;  %v947_v6 = vadd.f32 %v2252_v48, %v909_v56  ;;  %v895_v59 = vmul.f32 %v2231_v23, %v838_v4  ;;  %v910_v21 = vmul.f32 %v2231_v23, %v868_v20 }
 0x199   : > { %v811_v41 = vand.u32 2147483648, %v2480_v58  ;;  %1486 = vmatmul.mubr.msk.f32.gmra.mxu1 %vm235_vm0, %v946_v7  ;;  %1465 = vmatmul.mubr.msk.f32.gmra.mxu0 %vm235_vm0, %v932_v17  ;;  %v840_v19 = vmul.f32 %v1624_v54, %v2001_v35  ;;  %v911_v45 = vmul.f32 %v2231_v23, %v870_v43  ;;  %vm810_vm5 = vcmp.eq.f32.partialorder %v2480_v58, 0.0 }
 0x19a   : > { %v809_v5 = vsel %vm808_vm4, %v2480_v58, %v807_v8  ;;  %1488 = vmatprep.mubr.msk.f32.mxu1 %vm235_vm0, %v947_v6  ;;  %v933_v15 = vadd.f32 %v2252_v48, %v895_v59  ;;  %v948_v50 = vadd.f32 %v2252_v48, %v910_v21  ;;  %v2703_v58 = vld [vmem:[#allocation2_spill] sm:$0xff]  ;;  %vm1279_vm6 = vcmask 195584  }
 0x19b   : > { %v812_v12 = vsel %vm810_vm5, %v811_v41, %v809_v5  ;;  %v896_v26 = vmul.f32 %v2231_v23, %v840_v19  ;;  %v949_v9 = vadd.f32 %v2252_v48, %v911_v45 }
 0x19c   : > { %1633 = vrcp.f32 %v812_v12  ;;  %1467 = vmatprep.mubr.msk.f32.mxu0 %vm235_vm0, %v933_v15 }
 0x19d   : > { %v1626_v35 = vpop.eup %1625  ;;  %1489 = vmatmul.mubr.msk.f32.gmra.mxu1 %vm235_vm0, %v948_v50  ;;  %v934_v34 = vadd.f32 %v2252_v48, %v896_v26 }
 0x19e   : > { %1491 = vmatprep.mubr.msk.f32.mxu1 %vm235_vm0, %v949_v9  ;;  %v872_v42 = vmul.f32 %v1626_v35, %v2703_v58 }
 0x19f   : > { %v1628_v1 = vpop.eup %1627  ;;  %1468 = vmatmul.mubr.msk.f32.gmra.mxu0 %vm235_vm0, %v934_v34 }
 0x1a0   : > { %v842_v32 = vmul.f32 %v1628_v1, %v2704_v36  ;;  %v912_v61 = vmul.f32 %v2231_v23, %v872_v42 }
 0x1a2   : > { %v1630_v3 = vpop.eup %1629  ;;  %v897_v46 = vmul.f32 %v2231_v23, %v842_v32  ;;  %v950_v2 = vadd.f32 %v2252_v48, %v912_v61 }
 0x1a3   : > { %v1632_v10 = vpop.eup %1631  ;;  %v874_v25 = vmul.f32 %v1630_v3, %v2705_v27 }
 0x1a4   : > { %v935_v14 = vadd.f32 %v2252_v48, %v897_v46  ;;  %1492 = vmatmul.mubr.msk.f32.gmra.mxu1 %vm235_vm0, %v950_v2  ;;  %v844_v29 = vmul.f32 %v1632_v10, %v2706_v31 }
 0x1a5   : > { %v913_v22 = vmul.f32 %v2231_v23, %v874_v25 }
 0x1a6   : > { %1470 = vmatprep.mubr.msk.f32.mxu0 %vm235_vm0, %v935_v14  ;;  %v898_v55 = vmul.f32 %v2231_v23, %v844_v29 }
 0x1a7   : > { %v951_v62 = vadd.f32 %v2252_v48, %v913_v22 }
 0x1a8   : > { %v936_v18 = vadd.f32 %v2252_v48, %v898_v55 }
 0x1a9   : > { %v1634_v60 = vpop.eup %1633  ;;  %1494 = vmatprep.mubr.msk.f32.mxu1 %vm235_vm0, %v951_v62 }
 0x1aa   : > { %1471 = vmatmul.mubr.msk.f32.gmra.mxu0 %vm235_vm0, %v936_v18  ;;  %v876_v49 = vmul.f32 %v1634_v60, %v2707_v13 }
 0x1ac   : > { %v914_v52 = vmul.f32 %v2231_v23, %v876_v49 }
 0x1ae   : > { %v952_v39 = vadd.f32 %v2252_v48, %v914_v52 }
 0x1b0   : > { %1495 = vmatmul.mubr.msk.f32.gmra.mxu1 %vm235_vm0, %v952_v39 }
 0x22c   : > { %v1451_v23 = vpop.f32.mrf.mxu0 }
 0x22d   : > { %1281 = vst.msk [vmem:[%s2619_s30 + $0x8] sm:$0xff] %vm1279_vm6, %v1451_v23 }
 0x22e   : > { %v1120_v48 = vpop.f32.mrf.mxu0 }
 0x22f   : > { %1280 = vst.msk [vmem:[%s2619_s30] sm:$0xff] %vm1279_vm6, %v1120_v48 }
 0x237   : > { %v1475_v44 = vpop.f32.mrf.mxu1 }
 0x238   : > { %1297 = vst.msk [vmem:[%s2619_s30 + $0x88] sm:$0xff] %vm1279_vm6, %v1475_v44 }
 0x239   : > { %v1200_v28 = vpop.f32.mrf.mxu1 }
 0x23a   : > { %1296 = vst.msk [vmem:[%s2619_s30 + $0x80] sm:$0xff] %vm1279_vm6, %v1200_v28 }
 0x23b   : > { %v1454_v47 = vpop.f32.mrf.mxu0 }
 0x23c   : > { %1283 = vst.msk [vmem:[%s2619_s30 + $0x18] sm:$0xff] %vm1279_vm6, %v1454_v47 }
 0x23d   : > { %v1130_v38 = vpop.f32.mrf.mxu0 }
 0x23e   : > { %1282 = vst.msk [vmem:[%s2619_s30 + $0x10] sm:$0xff] %vm1279_vm6, %v1130_v38 }
 0x244   : > { %v1478_v57 = vpop.f32.mrf.mxu1 }
 0x245   : > { %1299 = vst.msk [vmem:[%s2619_s30 + $0x98] sm:$0xff] %vm1279_vm6, %v1478_v57 }
 0x246   : > { %v1210_v16 = vpop.f32.mrf.mxu1 }
 0x247   : > { %1298 = vst.msk [vmem:[%s2619_s30 + $0x90] sm:$0xff] %vm1279_vm6, %v1210_v16  ;;  %v1457_v51 = vpop.f32.mrf.mxu0 }
 0x248   : > { %1285 = vst.msk [vmem:[%s2619_s30 + $0x28] sm:$0xff] %vm1279_vm6, %v1457_v51 }
 0x249   : > { %v1140_v53 = vpop.f32.mrf.mxu0 }
 0x24a   : > { %1284 = vst.msk [vmem:[%s2619_s30 + $0x20] sm:$0xff] %vm1279_vm6, %v1140_v53 }
 0x24d   : > { %v1481_v24 = vpop.f32.mrf.mxu1 }
 0x24e   : > { %1301 = vst.msk [vmem:[%s2619_s30 + $0xa8] sm:$0xff] %vm1279_vm6, %v1481_v24 }
 0x24f   : > { %v1220_v40 = vpop.f32.mrf.mxu1 }
 0x250   : > { %1300 = vst.msk [vmem:[%s2619_s30 + $0xa0] sm:$0xff] %vm1279_vm6, %v1220_v40  ;;  %v1460_v30 = vpop.f32.mrf.mxu0 }
 0x251   : > { %1287 = vst.msk [vmem:[%s2619_s30 + $0x38] sm:$0xff] %vm1279_vm6, %v1460_v30 }
 0x252   : > { %v1150_v33 = vpop.f32.mrf.mxu0 }
 0x253   : > { %1286 = vst.msk [vmem:[%s2619_s30 + $0x30] sm:$0xff] %vm1279_vm6, %v1150_v33  ;;  %v1484_v63 = vpop.f32.mrf.mxu1 }
 0x254   : > { %1303 = vst.msk [vmem:[%s2619_s30 + $0xb8] sm:$0xff] %vm1279_vm6, %v1484_v63  ;;  %v1463_v37 = vpop.f32.mrf.mxu0 }
 0x255   : > { %v1230_v11 = vpop.f32.mrf.mxu1  ;;  %1289 = vst.msk [vmem:[%s2619_s30 + $0x48] sm:$0xff] %vm1279_vm6, %v1463_v37 }
 0x256   : > { %1302 = vst.msk [vmem:[%s2619_s30 + $0xb0] sm:$0xff] %vm1279_vm6, %v1230_v11  ;;  %v1160_v56 = vpop.f32.mrf.mxu0 }
 0x257   : > { %1288 = vst.msk [vmem:[%s2619_s30 + $0x40] sm:$0xff] %vm1279_vm6, %v1160_v56 }
 0x259   : > { %v1487_v4 = vpop.f32.mrf.mxu1  ;;  %v1466_v20 = vpop.f32.mrf.mxu0 }
 0x25a   : > { %1305 = vst.msk [vmem:[%s2619_s30 + $0xc8] sm:$0xff] %vm1279_vm6, %v1487_v4  ;;  %1291 = vst.msk [vmem:[%s2619_s30 + $0x58] sm:$0xff] %vm1279_vm6, %v1466_v20 }
 0x25b   : > { %v1240_v0 = vpop.f32.mrf.mxu1  ;;  %v1170_v7 = vpop.f32.mrf.mxu0 }
 0x25c   : > { %1304 = vst.msk [vmem:[%s2619_s30 + $0xc0] sm:$0xff] %vm1279_vm6, %v1240_v0  ;;  %1290 = vst.msk [vmem:[%s2619_s30 + $0x50] sm:$0xff] %vm1279_vm6, %v1170_v7 }
 0x25d   : > { %v1490_v17 = vpop.f32.mrf.mxu1 }
 0x25e   : > { %1307 = vst.msk [vmem:[%s2619_s30 + $0xd8] sm:$0xff] %vm1279_vm6, %v1490_v17 }
 0x25f   : > { %v1250_v43 = vpop.f32.mrf.mxu1  ;;  %v1469_v54 = vpop.f32.mrf.mxu0 }
 0x260   : > { %1306 = vst.msk [vmem:[%s2619_s30 + $0xd0] sm:$0xff] %vm1279_vm6, %v1250_v43  ;;  %1293 = vst.msk [vmem:[%s2619_s30 + $0x68] sm:$0xff] %vm1279_vm6, %v1469_v54 }
 0x261   : > { %v1180_v8 = vpop.f32.mrf.mxu0 }
 0x262   : > { %1292 = vst.msk [vmem:[%s2619_s30 + $0x60] sm:$0xff] %vm1279_vm6, %v1180_v8 }
 0x264   : > { %v1493_v6 = vpop.f32.mrf.mxu1 }
 0x265   : > { %1309 = vst.msk [vmem:[%s2619_s30 + $0xe8] sm:$0xff] %vm1279_vm6, %v1493_v6 }
 0x266   : > { %v1260_v59 = vpop.f32.mrf.mxu1 }
 0x267   : > { %1308 = vst.msk [vmem:[%s2619_s30 + $0xe0] sm:$0xff] %vm1279_vm6, %v1260_v59 }
 0x26a   : > { %v1472_v21 = vpop.f32.mrf.mxu0 }
 0x26b   : > { %1295 = vst.msk [vmem:[%s2619_s30 + $0x78] sm:$0xff] %vm1279_vm6, %v1472_v21 }
 0x26c   : > { %v1190_v41 = vpop.f32.mrf.mxu0 }
 0x26d   : > { %1294 = vst.msk [vmem:[%s2619_s30 + $0x70] sm:$0xff] %vm1279_vm6, %v1190_v41 }
 0x270   : > { %v1496_v19 = vpop.f32.mrf.mxu1 }
 0x271   : > { %1311 = vst.msk [vmem:[%s2619_s30 + $0xf8] sm:$0xff] %vm1279_vm6, %v1496_v19 }
 0x272   : > { %v1270_v45 = vpop.f32.mrf.mxu1 }
 0x273   : > { %1310 = vst.msk [vmem:[%s2619_s30 + $0xf0] sm:$0xff] %vm1279_vm6, %v1270_v45 }
 0x274 PF: > { %s14_s15 = sadd.s32 1, %s1641_s15  }
 0x275   : > { %p11_p4 = scmp.ge.s32.totalorder %s14_s15, 4  }
 0x277   :  { %13 = sbr.rel (!%p11_p4) target bundleno = 1 (0x1), region = 66 }

</bundles_post_ra>
